<compile_context>
chip_gen: v7x
topology: tpu7x:2x2x1
jax: 0.10.0
libtpu: 0.0.40
codegen_flags: <defaults>
</compile_context>

<pallas_src>
import functools

import jax
import jax.numpy as jnp
from jax.experimental import pallas as pl
from jax.experimental.pallas import tpu as pltpu


def _round_up(x, m):
    return ((x + m - 1) // m) * m


def _pick_time_chunk(T, Bb, H, max_bytes=2 << 20):
    """Largest divisor of T whose chunk scratches (proj f32 + y f32) fit budget."""
    per_step = Bb * (4 * H + H) * 4
    cap = max(1, max_bytes // per_step)
    best = 1
    for d in range(1, T + 1):
        if T % d == 0 and d <= cap:
            best = d
    return best


# ----------------------------------------------------------------------------
# Fused kernel builder: L-layer LSTM + fc(H->1) + swish, single pallas_call.
# Grid = (batch_tiles [parallel], time_chunks [arbitrary]).
# ----------------------------------------------------------------------------
@functools.lru_cache(maxsize=None)
def _build_fused_forward(T, Tc, Bp, Bb, D, H, L):
    n_chunks = T // Tc
    n_btiles = Bp // Bb
    TBc = Tc * Bb
    dims = [D] + [H] * (L - 1)

    def kernel(*refs):
        x_ref = refs[0]                        # (Tc, Bb, D) bf16 block
        w_refs = refs[1:1 + 3 * L]             # per layer: wih_t, whh_t, bias
        fc_w_ref = refs[1 + 3 * L]             # (1, H)   f32
        fc_b_ref = refs[2 + 3 * L]             # (1, 1)   f32
        beta_ref = refs[3 + 3 * L]             # (1, 1)   f32
        out_ref = refs[4 + 3 * L]              # (Bb, 1)  f32
        proj_sc = refs[5 + 3 * L]              # VMEM (Tc*Bb, 4H) f32
        y_sc = refs[6 + 3 * L]                 # VMEM (Tc*Bb, H)  f32
        h_sc = refs[7 + 3 * L]                 # VMEM (L, Bb, H)  f32 carries
        c_sc = refs[8 + 3 * L]                 # VMEM (L, Bb, H)  f32 carries

        chunk = pl.program_id(1)

        @pl.when(chunk == 0)
        def _():
            h_sc[...] = jnp.zeros_like(h_sc)
            c_sc[...] = jnp.zeros_like(c_sc)

        # Layer-0 input for this time chunk, flattened time-major.
        seq = x_ref[...].reshape(TBc, D)       # bf16

        for l in range(L):
            wih_ref = w_refs[3 * l]            # (D_l, 4H) bf16
            whh_ref = w_refs[3 * l + 1]        # (H, 4H)   bf16
            bias = w_refs[3 * l + 2][...]      # (1, 4H)   f32

            # Bulk input projection for the whole chunk in ONE MXU matmul
            # (bf16 operands, f32 accumulation), bias fused; no recurrent
            # dependency -> off the serial critical path.
            proj_sc[...] = (
                jnp.dot(seq.astype(jnp.bfloat16), wih_ref[...],
                        preferred_element_type=jnp.float32) + bias)

            last_layer = (l == L - 1)

            def step(t, carry, _whh_ref=whh_ref, _write=not last_layer):
                h, c = carry
                row = pl.ds(pl.multiple_of(t * Bb, 8), Bb)
                # Only h @ W_hh remains on the serial path.
                # TODO(synk): stage W_hh in the MXU across the loop via
                # pltpu.matmul_push_rhs/acc_lhs/pop instead of re-pushing the
                # loop-invariant RHS every step.
                gates = proj_sc[row, :] + jnp.dot(
                    h.astype(jnp.bfloat16), _whh_ref[...],
                    preferred_element_type=jnp.float32)          # (Bb, 4H) f32
                # NOTE: H<128 gate slices cost lane shuffles; lane-aligned for
                # production H >= 128.
                i_g = jax.nn.sigmoid(gates[:, 0 * H:1 * H])
                f_g = jax.nn.sigmoid(gates[:, 1 * H:2 * H])
                g_g = jnp.tanh(gates[:, 2 * H:3 * H])
                o_g = jax.nn.sigmoid(gates[:, 3 * H:4 * H])
                c_new = f_g * c + i_g * g_g
                h_new = o_g * jnp.tanh(c_new)
                if _write:                     # feed next layer from VMEM
                    y_sc[row, :] = h_new
                return (h_new, c_new)

            carry0 = (h_sc[l], c_sc[l])
            h_f, c_f = jax.lax.fori_loop(0, Tc, step, carry0,
                                         unroll=min(Tc, 8))
            h_sc[l] = h_f
            c_sc[l] = c_f

            if not last_layer:
                seq = y_sc[...]                # (Tc*Bb, H) f32, stays in VMEM

        # self.dropout(hidden): p=0.3 is identity in eval mode.
        # TODO(synk): training-mode dropout (random mask + 1/(1-p)) not applied.

        @pl.when(chunk == pl.num_programs(1) - 1)
        def _():
            # Head: fc(H->1) as VPU multiply + lane reduce (no N=1 MXU dot),
            # then swish(beta * x).  f32 throughout.
            h_last = h_sc[L - 1]                                   # (Bb, H)
            logits = (jnp.sum(h_last * fc_w_ref[...], axis=-1, keepdims=True)
                      + fc_b_ref[...])                             # (Bb, 1)
            beta = beta_ref[...]                                   # (1, 1)
            out_ref[...] = logits * jax.nn.sigmoid(beta * logits)

    # ----- specs -----
    def resident(shape):
        return pl.BlockSpec(shape, lambda b, c, _s=shape: (0,) * len(_s))

    x_spec = pl.BlockSpec((Tc, Bb, D), lambda b, c: (c, b, 0))
    in_specs = [x_spec]
    for l in range(L):
        in_specs += [resident((dims[l], 4 * H)),   # wih_t (bf16)
                     resident((H, 4 * H)),         # whh_t (bf16)
                     resident((1, 4 * H))]         # bias  (f32)
    in_specs += [resident((1, H)), resident((1, 1)), resident((1, 1))]
    out_spec = pl.BlockSpec((Bb, 1), lambda b, c: (b, 0))

    scratch_shapes = [
        pltpu.VMEM((TBc, 4 * H), jnp.float32),     # chunk input projection
        pltpu.VMEM((TBc, H), jnp.float32),         # inter-layer chunk sequence
        pltpu.VMEM((L, Bb, H), jnp.float32),       # h carries across chunks
        pltpu.VMEM((L, Bb, H), jnp.float32),       # c carries across chunks
    ]

    # Explicit VMEM budget: resident weights + double-buffered x block + scratch.
    w_bytes = 0
    for l in range(L):
        w_bytes += (dims[l] * 4 * H + H * 4 * H) * 2 + 4 * H * 4
    w_bytes += H * 4 + 4 + 4
    x_bytes = 2 * Tc * Bb * D * 2                  # double-buffered bf16 block
    scratch_bytes = (TBc * 4 * H + TBc * H + 2 * L * Bb * H) * 4
    vmem_limit = int(1.5 * (w_bytes + x_bytes + scratch_bytes)) + (4 << 20)
    vmem_limit = min(max(vmem_limit, 16 << 20), 100 << 20)

    return pl.pallas_call(
        kernel,
        out_shape=jax.ShapeDtypeStruct((Bp, 1), jnp.float32),
        grid_spec=pltpu.PrefetchScalarGridSpec(
            num_scalar_prefetch=0,
            grid=(n_btiles, n_chunks),
            in_specs=in_specs,
            out_specs=out_spec,
            scratch_shapes=scratch_shapes),
        compiler_params=pltpu.CompilerParams(
            dimension_semantics=("parallel", "arbitrary"),
            vmem_limit_bytes=vmem_limit),
    )


# ----------------------------------------------------------------------------
# Full forward (batch_first input, like PyTorch)
# ----------------------------------------------------------------------------
@jax.jit
def lstm_model_forward(x_btd, params):
    B, T, D = x_btd.shape
    layers = params["lstm"]
    H = layers[0]["whh_t"].shape[0]
    L = len(layers)

    Bp = _round_up(max(B, 8), 8)                   # sublane-aligned batch
    n_btiles = 2 if (Bp >= 16 and Bp % 16 == 0) else 1   # v7x: one tile per TC
    Bb = Bp // n_btiles
    Tc = _pick_time_chunk(T, Bb, H)

    # TODO(synk): fold this transpose/pad/cast into the kernel's x DMA (it is
    # an extra HBM pass over x at production sizes).
    x = jnp.transpose(x_btd, (1, 0, 2)).astype(jnp.bfloat16)   # (T, B, D)
    x = jnp.pad(x, ((0, 0), (0, Bp - B), (0, 0)))              # (T, Bp, D)

    flat_inputs = [x]
    for layer in layers:
        flat_inputs += [layer["wih_t"], layer["whh_t"], layer["b"]]
    flat_inputs += [params["fc_w"], params["fc_b"], params["beta"]]

    out = _build_fused_forward(T, Tc, Bp, Bb, D, H, L)(*flat_inputs)  # (Bp, 1)
    return out[:B, 0]                                                 # (B,)


# ----------------------------------------------------------------------------
# Deterministic parameter init (PyTorch-style U(-1/sqrt(H), 1/sqrt(H)))
# ----------------------------------------------------------------------------
def init_params(key, input_size, hidden_size, num_layers):
    H = hidden_size
    bound = 1.0 / jnp.sqrt(jnp.float32(H))
    layers = []
    for l in range(num_layers):
        d_in = input_size if l == 0 else H
        key, k1, k2, k3, k4 = jax.random.split(key, 5)
        w_ih = jax.random.uniform(k1, (4 * H, d_in), jnp.float32, -bound, bound)
        w_hh = jax.random.uniform(k2, (4 * H, H), jnp.float32, -bound, bound)
        b_ih = jax.random.uniform(k3, (4 * H,), jnp.float32, -bound, bound)
        b_hh = jax.random.uniform(k4, (4 * H,), jnp.float32, -bound, bound)
        layers.append({
            "wih_t": w_ih.T.astype(jnp.bfloat16),      # (d_in, 4H) MXU operand
            "whh_t": w_hh.T.astype(jnp.bfloat16),      # (H, 4H)    MXU operand
            "b": (b_ih + b_hh).reshape(1, 4 * H),      # (1, 4H)    f32
        })
    key, kw, kb = jax.random.split(key, 3)
    fc_w = jax.random.uniform(kw, (1, H), jnp.float32, -bound, bound)
    fc_b = jax.random.uniform(kb, (1,), jnp.float32, -bound, bound)
    return {
        "lstm": layers,
        "fc_w": fc_w,                      # (1, H) f32
        "fc_b": fc_b.reshape(1, 1),        # (1, 1) f32
        "beta": jnp.ones((1, 1), jnp.float32),
    }


# ----------------------------------------------------------------------------
# Pure-JAX f32 reference (for sanity check; same bf16-rounded weights)
# ----------------------------------------------------------------------------
def reference_forward(x_btd, params):
    x = jnp.transpose(x_btd, (1, 0, 2)).astype(jnp.float32)  # (T, B, D)
    T, B, _ = x.shape
    h_last = None
    for layer in params["lstm"]:
        H = layer["whh_t"].shape[0]
        wih = layer["wih_t"].astype(jnp.float32)
        whh = layer["whh_t"].astype(jnp.float32)
        h = jnp.zeros((B, H), jnp.float32)
        c = jnp.zeros((B, H), jnp.float32)
        ys = []
        for t in range(T):
            gates = x[t] @ wih + h @ whh + layer["b"]
            i_g = jax.nn.sigmoid(gates[:, 0 * H:1 * H])
            f_g = jax.nn.sigmoid(gates[:, 1 * H:2 * H])
            g_g = jnp.tanh(gates[:, 2 * H:3 * H])
            o_g = jax.nn.sigmoid(gates[:, 3 * H:4 * H])
            c = f_g * c + i_g * g_g
            h = o_g * jnp.tanh(c)
            ys.append(h)
        x = jnp.stack(ys, axis=0)
        h_last = h
    out = h_last @ params["fc_w"].T + params["fc_b"]
    out = out * jax.nn.sigmoid(params["beta"][0, 0] * out)
    return jnp.squeeze(out, axis=-1)


if __name__ == "__main__":
    input_size, hidden_size, num_layers = 16, 32, 2
    B, T = 2, 8

    key = jax.random.PRNGKey(0)
    key, kx, kp = jax.random.split(key, 3)
    x = jax.random.normal(kx, (B, T, input_size), jnp.float32)
    params = init_params(kp, input_size, hidden_size, num_layers)

    out = lstm_model_forward(x, params)
    out = jax.block_until_ready(out)

    ref = jax.block_until_ready(reference_forward(x, params))
    assert out.shape == (B,)
    # bf16 MXU operands vs f32 reference -> slightly looser tolerance.
    assert jnp.allclose(out, ref, atol=2e-2, rtol=2e-2), (out, ref)

    print("KERNEL_OK")
</pallas_src>

<mosaic_0001>
module attributes {stable_mosaic.version = 11 : i64} {
  func.func @kernel(%arg0: i32, %arg1: i32, %arg2: memref<8x8x16xbf16, #tpu.memory_space<vmem>>, %arg3: memref<16x128xbf16, #tpu.memory_space<vmem>>, %arg4: memref<32x128xbf16, #tpu.memory_space<vmem>>, %arg5: memref<1x128xf32, #tpu.memory_space<vmem>>, %arg6: memref<32x128xbf16, #tpu.memory_space<vmem>>, %arg7: memref<32x128xbf16, #tpu.memory_space<vmem>>, %arg8: memref<1x128xf32, #tpu.memory_space<vmem>>, %arg9: memref<1x32xf32, #tpu.memory_space<vmem>>, %arg10: memref<1x1xf32, #tpu.memory_space<vmem>>, %arg11: memref<1x1xf32, #tpu.memory_space<vmem>>, %arg12: memref<8x1xf32, #tpu.memory_space<vmem>>, %arg13: memref<64x128xf32, #tpu.memory_space<vmem>>, %arg14: memref<64x32xf32, #tpu.memory_space<vmem>>, %arg15: memref<2x8x32xf32, #tpu.memory_space<vmem>>, %arg16: memref<2x8x32xf32, #tpu.memory_space<vmem>>) attributes {dimension_semantics = [#tpu.dimension_semantics<parallel>, #tpu.dimension_semantics<arbitrary>], iteration_bounds = array<i64: 1, 1>, scalar_prefetch = 0 : i64, scratch_operands = 4 : i64, tpu.core_type = #tpu.core_type<tc>, window_params = [{transform_indices = @transform_0, window_bounds = array<i64: 8, 8, 16>}, {pipeline_mode = #tpu.pipeline_mode<synchronous>, transform_indices = @transform_1, window_bounds = array<i64: 16, 128>}, {pipeline_mode = #tpu.pipeline_mode<synchronous>, transform_indices = @transform_2, window_bounds = array<i64: 32, 128>}, {pipeline_mode = #tpu.pipeline_mode<synchronous>, transform_indices = @transform_3, window_bounds = array<i64: 1, 128>}, {pipeline_mode = #tpu.pipeline_mode<synchronous>, transform_indices = @transform_4, window_bounds = array<i64: 32, 128>}, {pipeline_mode = #tpu.pipeline_mode<synchronous>, transform_indices = @transform_5, window_bounds = array<i64: 32, 128>}, {pipeline_mode = #tpu.pipeline_mode<synchronous>, transform_indices = @transform_6, window_bounds = array<i64: 1, 128>}, {pipeline_mode = #tpu.pipeline_mode<synchronous>, transform_indices = @transform_7, window_bounds = array<i64: 1, 32>}, {pipeline_mode = #tpu.pipeline_mode<synchronous>, transform_indices = @transform_8, window_bounds = array<i64: 1, 1>}, {pipeline_mode = #tpu.pipeline_mode<synchronous>, transform_indices = @transform_9, window_bounds = array<i64: 1, 1>}, {transform_indices = @transform_10, window_bounds = array<i64: 8, 1>}]} {
    %c0_i32 = arith.constant 0 : i32
    %0 = arith.cmpi eq, %arg1, %c0_i32 : i32
    %1 = arith.extui %0 : i1 to i32
    %c0_i32_0 = arith.constant 0 : i32
    %2 = arith.cmpi ne, %1, %c0_i32_0 : i32
    scf.if %2 {
      %cst_189 = arith.constant 0.000000e+00 : f32
      %586 = vector.broadcast %cst_189 : f32 to vector<2x8x32xf32>
      %c0_190 = arith.constant 0 : index
      %c0_191 = arith.constant 0 : index
      %c0_192 = arith.constant 0 : index
      %587 = vector.load %arg15[%c0_190, %c0_191, %c0_192] : memref<2x8x32xf32, #tpu.memory_space<vmem>>, vector<2x8x32xf32>
      tpu.vector_store %arg15[%c0_190, %c0_191, %c0_192], %586 {strides = array<i32>} : memref<2x8x32xf32, #tpu.memory_space<vmem>>, vector<2x8x32xf32>,
      %cst_193 = arith.constant 0.000000e+00 : f32
      %588 = vector.broadcast %cst_193 : f32 to vector<2x8x32xf32>
      %c0_194 = arith.constant 0 : index
      %c0_195 = arith.constant 0 : index
      %c0_196 = arith.constant 0 : index
      %589 = vector.load %arg16[%c0_194, %c0_195, %c0_196] : memref<2x8x32xf32, #tpu.memory_space<vmem>>, vector<2x8x32xf32>
      tpu.vector_store %arg16[%c0_194, %c0_195, %c0_196], %588 {strides = array<i32>} : memref<2x8x32xf32, #tpu.memory_space<vmem>>, vector<2x8x32xf32>,
    } else {
    }
    %c0 = arith.constant 0 : index
    %c0_1 = arith.constant 0 : index
    %c0_2 = arith.constant 0 : index
    %3 = vector.load %arg2[%c0, %c0_1, %c0_2] : memref<8x8x16xbf16, #tpu.memory_space<vmem>>, vector<8x8x16xbf16>
    %4 = vector.shape_cast %3 : vector<8x8x16xbf16> to vector<64x16xbf16>
    %c0_3 = arith.constant 0 : index
    %c0_4 = arith.constant 0 : index
    %5 = vector.load %arg5[%c0_3, %c0_4] : memref<1x128xf32, #tpu.memory_space<vmem>>, vector<1x128xf32>
    %c0_5 = arith.constant 0 : index
    %c0_6 = arith.constant 0 : index
    %6 = vector.load %arg3[%c0_5, %c0_6] : memref<16x128xbf16, #tpu.memory_space<vmem>>, vector<16x128xbf16>
    %cst = arith.constant dense<0.000000e+00> : vector<64x128xf32>
    %7 = tpu.matmul %4, %6, %cst {dimension_numbers = #tpu.dot_dimension_numbers<[1], [0], [0], [1], [0, 0, 1, 1], [], []>} : vector<64x16xbf16>, vector<16x128xbf16>, vector<64x128xf32> -> vector<64x128xf32>
    %8 = vector.broadcast %5 : vector<1x128xf32> to vector<64x128xf32>
    %9 = arith.addf %7, %8 : vector<64x128xf32>
    %c0_7 = arith.constant 0 : index
    %c0_8 = arith.constant 0 : index
    %10 = vector.load %arg13[%c0_7, %c0_8] : memref<64x128xf32, #tpu.memory_space<vmem>>, vector<64x128xf32>
    tpu.vector_store %arg13[%c0_7, %c0_8], %9 {strides = array<i32>} : memref<64x128xf32, #tpu.memory_space<vmem>>, vector<64x128xf32>,
    %c0_9 = arith.constant 0 : index
    %c0_10 = arith.constant 0 : index
    %c0_11 = arith.constant 0 : index
    %11 = vector.load %arg15[%c0_9, %c0_10, %c0_11] : memref<2x8x32xf32, #tpu.memory_space<vmem>>, vector<1x8x32xf32>
    %12 = vector.shape_cast %11 : vector<1x8x32xf32> to vector<8x32xf32>
    %c0_12 = arith.constant 0 : index
    %c0_13 = arith.constant 0 : index
    %c0_14 = arith.constant 0 : index
    %13 = vector.load %arg16[%c0_12, %c0_13, %c0_14] : memref<2x8x32xf32, #tpu.memory_space<vmem>>, vector<1x8x32xf32>
    %14 = vector.shape_cast %13 : vector<1x8x32xf32> to vector<8x32xf32>
    %c0_i32_15 = arith.constant 0 : i32
    %c8_i32 = arith.constant 8 : i32
    %15 = arith.muli %c0_i32_15, %c8_i32 : i32
    %16 = tpu.assume_multiple %15, 8 : i32
    %17 = arith.index_cast %16 : i32 to index
    %c0_16 = arith.constant 0 : index
    %18 = vector.load %arg13[%17, %c0_16] : memref<64x128xf32, #tpu.memory_space<vmem>>, vector<8x128xf32>
    %19 = arith.truncf %12 : vector<8x32xf32> to vector<8x32xbf16>
    %c0_17 = arith.constant 0 : index
    %c0_18 = arith.constant 0 : index
    %20 = vector.load %arg4[%c0_17, %c0_18] : memref<32x128xbf16, #tpu.memory_space<vmem>>, vector<32x128xbf16>
    %cst_19 = arith.constant dense<0.000000e+00> : vector<8x128xf32>
    %21 = tpu.matmul %19, %20, %cst_19 {dimension_numbers = #tpu.dot_dimension_numbers<[1], [0], [0], [1], [0, 0, 1, 1], [], []>} : vector<8x32xbf16>, vector<32x128xbf16>, vector<8x128xf32> -> vector<8x128xf32>
    %22 = arith.addf %18, %21 : vector<8x128xf32>
    %23 = vector.extract_strided_slice %22 {offsets = [0, 0], sizes = [8, 32], strides = [1, 1]} : vector<8x128xf32> to vector<8x32xf32>
    %24 = arith.negf %23 : vector<8x32xf32>
    %25 = math.exp %24 : vector<8x32xf32>
    %cst_20 = arith.constant 1.000000e+00 : f32
    %26 = vector.broadcast %cst_20 : f32 to vector<8x32xf32>
    %27 = arith.addf %26, %25 : vector<8x32xf32>
    %28 = arith.divf %26, %27 : vector<8x32xf32>
    %29 = vector.extract_strided_slice %22 {offsets = [0, 32], sizes = [8, 32], strides = [1, 1]} : vector<8x128xf32> to vector<8x32xf32>
    %30 = arith.negf %29 : vector<8x32xf32>
    %31 = math.exp %30 : vector<8x32xf32>
    %cst_21 = arith.constant 1.000000e+00 : f32
    %32 = vector.broadcast %cst_21 : f32 to vector<8x32xf32>
    %33 = arith.addf %32, %31 : vector<8x32xf32>
    %34 = arith.divf %32, %33 : vector<8x32xf32>
    %35 = vector.extract_strided_slice %22 {offsets = [0, 64], sizes = [8, 32], strides = [1, 1]} : vector<8x128xf32> to vector<8x32xf32>
    %36 = math.tanh %35 : vector<8x32xf32>
    %37 = vector.extract_strided_slice %22 {offsets = [0, 96], sizes = [8, 32], strides = [1, 1]} : vector<8x128xf32> to vector<8x32xf32>
    %38 = arith.negf %37 : vector<8x32xf32>
    %39 = math.exp %38 : vector<8x32xf32>
    %cst_22 = arith.constant 1.000000e+00 : f32
    %40 = vector.broadcast %cst_22 : f32 to vector<8x32xf32>
    %41 = arith.addf %40, %39 : vector<8x32xf32>
    %42 = arith.divf %40, %41 : vector<8x32xf32>
    %43 = arith.mulf %34, %14 : vector<8x32xf32>
    %44 = arith.mulf %28, %36 : vector<8x32xf32>
    %45 = arith.addf %43, %44 : vector<8x32xf32>
    %46 = math.tanh %45 : vector<8x32xf32>
    %47 = arith.mulf %42, %46 : vector<8x32xf32>
    %48 = arith.index_cast %16 : i32 to index
    %c0_23 = arith.constant 0 : index
    %49 = vector.load %arg14[%48, %c0_23] : memref<64x32xf32, #tpu.memory_space<vmem>>, vector<8x32xf32>
    tpu.vector_store %arg14[%48, %c0_23], %47 {strides = array<i32>} : memref<64x32xf32, #tpu.memory_space<vmem>>, vector<8x32xf32>,
    %c1_i32 = arith.constant 1 : i32
    %c8_i32_24 = arith.constant 8 : i32
    %50 = arith.muli %c1_i32, %c8_i32_24 : i32
    %51 = tpu.assume_multiple %50, 8 : i32
    %52 = arith.index_cast %51 : i32 to index
    %c0_25 = arith.constant 0 : index
    %53 = vector.load %arg13[%52, %c0_25] : memref<64x128xf32, #tpu.memory_space<vmem>>, vector<8x128xf32>
    %54 = arith.truncf %47 : vector<8x32xf32> to vector<8x32xbf16>
    %c0_26 = arith.constant 0 : index
    %c0_27 = arith.constant 0 : index
    %55 = vector.load %arg4[%c0_26, %c0_27] : memref<32x128xbf16, #tpu.memory_space<vmem>>, vector<32x128xbf16>
    %cst_28 = arith.constant dense<0.000000e+00> : vector<8x128xf32>
    %56 = tpu.matmul %54, %55, %cst_28 {dimension_numbers = #tpu.dot_dimension_numbers<[1], [0], [0], [1], [0, 0, 1, 1], [], []>} : vector<8x32xbf16>, vector<32x128xbf16>, vector<8x128xf32> -> vector<8x128xf32>
    %57 = arith.addf %53, %56 : vector<8x128xf32>
    %58 = vector.extract_strided_slice %57 {offsets = [0, 0], sizes = [8, 32], strides = [1, 1]} : vector<8x128xf32> to vector<8x32xf32>
    %59 = arith.negf %58 : vector<8x32xf32>
    %60 = math.exp %59 : vector<8x32xf32>
    %cst_29 = arith.constant 1.000000e+00 : f32
    %61 = vector.broadcast %cst_29 : f32 to vector<8x32xf32>
    %62 = arith.addf %61, %60 : vector<8x32xf32>
    %63 = arith.divf %61, %62 : vector<8x32xf32>
    %64 = vector.extract_strided_slice %57 {offsets = [0, 32], sizes = [8, 32], strides = [1, 1]} : vector<8x128xf32> to vector<8x32xf32>
    %65 = arith.negf %64 : vector<8x32xf32>
    %66 = math.exp %65 : vector<8x32xf32>
    %cst_30 = arith.constant 1.000000e+00 : f32
    %67 = vector.broadcast %cst_30 : f32 to vector<8x32xf32>
    %68 = arith.addf %67, %66 : vector<8x32xf32>
    %69 = arith.divf %67, %68 : vector<8x32xf32>
    %70 = vector.extract_strided_slice %57 {offsets = [0, 64], sizes = [8, 32], strides = [1, 1]} : vector<8x128xf32> to vector<8x32xf32>
    %71 = math.tanh %70 : vector<8x32xf32>
    %72 = vector.extract_strided_slice %57 {offsets = [0, 96], sizes = [8, 32], strides = [1, 1]} : vector<8x128xf32> to vector<8x32xf32>
    %73 = arith.negf %72 : vector<8x32xf32>
    %74 = math.exp %73 : vector<8x32xf32>
    %cst_31 = arith.constant 1.000000e+00 : f32
    %75 = vector.broadcast %cst_31 : f32 to vector<8x32xf32>
    %76 = arith.addf %75, %74 : vector<8x32xf32>
    %77 = arith.divf %75, %76 : vector<8x32xf32>
    %78 = arith.mulf %69, %45 : vector<8x32xf32>
    %79 = arith.mulf %63, %71 : vector<8x32xf32>
    %80 = arith.addf %78, %79 : vector<8x32xf32>
    %81 = math.tanh %80 : vector<8x32xf32>
    %82 = arith.mulf %77, %81 : vector<8x32xf32>
    %83 = arith.index_cast %51 : i32 to index
    %c0_32 = arith.constant 0 : index
    %84 = vector.load %arg14[%83, %c0_32] : memref<64x32xf32, #tpu.memory_space<vmem>>, vector<8x32xf32>
    tpu.vector_store %arg14[%83, %c0_32], %82 {strides = array<i32>} : memref<64x32xf32, #tpu.memory_space<vmem>>, vector<8x32xf32>,
    %c2_i32 = arith.constant 2 : i32
    %c8_i32_33 = arith.constant 8 : i32
    %85 = arith.muli %c2_i32, %c8_i32_33 : i32
    %86 = tpu.assume_multiple %85, 8 : i32
    %87 = arith.index_cast %86 : i32 to index
    %c0_34 = arith.constant 0 : index
    %88 = vector.load %arg13[%87, %c0_34] : memref<64x128xf32, #tpu.memory_space<vmem>>, vector<8x128xf32>
    %89 = arith.truncf %82 : vector<8x32xf32> to vector<8x32xbf16>
    %c0_35 = arith.constant 0 : index
    %c0_36 = arith.constant 0 : index
    %90 = vector.load %arg4[%c0_35, %c0_36] : memref<32x128xbf16, #tpu.memory_space<vmem>>, vector<32x128xbf16>
    %cst_37 = arith.constant dense<0.000000e+00> : vector<8x128xf32>
    %91 = tpu.matmul %89, %90, %cst_37 {dimension_numbers = #tpu.dot_dimension_numbers<[1], [0], [0], [1], [0, 0, 1, 1], [], []>} : vector<8x32xbf16>, vector<32x128xbf16>, vector<8x128xf32> -> vector<8x128xf32>
    %92 = arith.addf %88, %91 : vector<8x128xf32>
    %93 = vector.extract_strided_slice %92 {offsets = [0, 0], sizes = [8, 32], strides = [1, 1]} : vector<8x128xf32> to vector<8x32xf32>
    %94 = arith.negf %93 : vector<8x32xf32>
    %95 = math.exp %94 : vector<8x32xf32>
    %cst_38 = arith.constant 1.000000e+00 : f32
    %96 = vector.broadcast %cst_38 : f32 to vector<8x32xf32>
    %97 = arith.addf %96, %95 : vector<8x32xf32>
    %98 = arith.divf %96, %97 : vector<8x32xf32>
    %99 = vector.extract_strided_slice %92 {offsets = [0, 32], sizes = [8, 32], strides = [1, 1]} : vector<8x128xf32> to vector<8x32xf32>
    %100 = arith.negf %99 : vector<8x32xf32>
    %101 = math.exp %100 : vector<8x32xf32>
    %cst_39 = arith.constant 1.000000e+00 : f32
    %102 = vector.broadcast %cst_39 : f32 to vector<8x32xf32>
    %103 = arith.addf %102, %101 : vector<8x32xf32>
    %104 = arith.divf %102, %103 : vector<8x32xf32>
    %105 = vector.extract_strided_slice %92 {offsets = [0, 64], sizes = [8, 32], strides = [1, 1]} : vector<8x128xf32> to vector<8x32xf32>
    %106 = math.tanh %105 : vector<8x32xf32>
    %107 = vector.extract_strided_slice %92 {offsets = [0, 96], sizes = [8, 32], strides = [1, 1]} : vector<8x128xf32> to vector<8x32xf32>
    %108 = arith.negf %107 : vector<8x32xf32>
    %109 = math.exp %108 : vector<8x32xf32>
    %cst_40 = arith.constant 1.000000e+00 : f32
    %110 = vector.broadcast %cst_40 : f32 to vector<8x32xf32>
    %111 = arith.addf %110, %109 : vector<8x32xf32>
    %112 = arith.divf %110, %111 : vector<8x32xf32>
    %113 = arith.mulf %104, %80 : vector<8x32xf32>
    %114 = arith.mulf %98, %106 : vector<8x32xf32>
    %115 = arith.addf %113, %114 : vector<8x32xf32>
    %116 = math.tanh %115 : vector<8x32xf32>
    %117 = arith.mulf %112, %116 : vector<8x32xf32>
    %118 = arith.index_cast %86 : i32 to index
    %c0_41 = arith.constant 0 : index
    %119 = vector.load %arg14[%118, %c0_41] : memref<64x32xf32, #tpu.memory_space<vmem>>, vector<8x32xf32>
    tpu.vector_store %arg14[%118, %c0_41], %117 {strides = array<i32>} : memref<64x32xf32, #tpu.memory_space<vmem>>, vector<8x32xf32>,
    %c3_i32 = arith.constant 3 : i32
    %c8_i32_42 = arith.constant 8 : i32
    %120 = arith.muli %c3_i32, %c8_i32_42 : i32
    %121 = tpu.assume_multiple %120, 8 : i32
    %122 = arith.index_cast %121 : i32 to index
    %c0_43 = arith.constant 0 : index
    %123 = vector.load %arg13[%122, %c0_43] : memref<64x128xf32, #tpu.memory_space<vmem>>, vector<8x128xf32>
    %124 = arith.truncf %117 : vector<8x32xf32> to vector<8x32xbf16>
    %c0_44 = arith.constant 0 : index
    %c0_45 = arith.constant 0 : index
    %125 = vector.load %arg4[%c0_44, %c0_45] : memref<32x128xbf16, #tpu.memory_space<vmem>>, vector<32x128xbf16>
    %cst_46 = arith.constant dense<0.000000e+00> : vector<8x128xf32>
    %126 = tpu.matmul %124, %125, %cst_46 {dimension_numbers = #tpu.dot_dimension_numbers<[1], [0], [0], [1], [0, 0, 1, 1], [], []>} : vector<8x32xbf16>, vector<32x128xbf16>, vector<8x128xf32> -> vector<8x128xf32>
    %127 = arith.addf %123, %126 : vector<8x128xf32>
    %128 = vector.extract_strided_slice %127 {offsets = [0, 0], sizes = [8, 32], strides = [1, 1]} : vector<8x128xf32> to vector<8x32xf32>
    %129 = arith.negf %128 : vector<8x32xf32>
    %130 = math.exp %129 : vector<8x32xf32>
    %cst_47 = arith.constant 1.000000e+00 : f32
    %131 = vector.broadcast %cst_47 : f32 to vector<8x32xf32>
    %132 = arith.addf %131, %130 : vector<8x32xf32>
    %133 = arith.divf %131, %132 : vector<8x32xf32>
    %134 = vector.extract_strided_slice %127 {offsets = [0, 32], sizes = [8, 32], strides = [1, 1]} : vector<8x128xf32> to vector<8x32xf32>
    %135 = arith.negf %134 : vector<8x32xf32>
    %136 = math.exp %135 : vector<8x32xf32>
    %cst_48 = arith.constant 1.000000e+00 : f32
    %137 = vector.broadcast %cst_48 : f32 to vector<8x32xf32>
    %138 = arith.addf %137, %136 : vector<8x32xf32>
    %139 = arith.divf %137, %138 : vector<8x32xf32>
    %140 = vector.extract_strided_slice %127 {offsets = [0, 64], sizes = [8, 32], strides = [1, 1]} : vector<8x128xf32> to vector<8x32xf32>
    %141 = math.tanh %140 : vector<8x32xf32>
    %142 = vector.extract_strided_slice %127 {offsets = [0, 96], sizes = [8, 32], strides = [1, 1]} : vector<8x128xf32> to vector<8x32xf32>
    %143 = arith.negf %142 : vector<8x32xf32>
    %144 = math.exp %143 : vector<8x32xf32>
    %cst_49 = arith.constant 1.000000e+00 : f32
    %145 = vector.broadcast %cst_49 : f32 to vector<8x32xf32>
    %146 = arith.addf %145, %144 : vector<8x32xf32>
    %147 = arith.divf %145, %146 : vector<8x32xf32>
    %148 = arith.mulf %139, %115 : vector<8x32xf32>
    %149 = arith.mulf %133, %141 : vector<8x32xf32>
    %150 = arith.addf %148, %149 : vector<8x32xf32>
    %151 = math.tanh %150 : vector<8x32xf32>
    %152 = arith.mulf %147, %151 : vector<8x32xf32>
    %153 = arith.index_cast %121 : i32 to index
    %c0_50 = arith.constant 0 : index
    %154 = vector.load %arg14[%153, %c0_50] : memref<64x32xf32, #tpu.memory_space<vmem>>, vector<8x32xf32>
    tpu.vector_store %arg14[%153, %c0_50], %152 {strides = array<i32>} : memref<64x32xf32, #tpu.memory_space<vmem>>, vector<8x32xf32>,
    %c4_i32 = arith.constant 4 : i32
    %c8_i32_51 = arith.constant 8 : i32
    %155 = arith.muli %c4_i32, %c8_i32_51 : i32
    %156 = tpu.assume_multiple %155, 8 : i32
    %157 = arith.index_cast %156 : i32 to index
    %c0_52 = arith.constant 0 : index
    %158 = vector.load %arg13[%157, %c0_52] : memref<64x128xf32, #tpu.memory_space<vmem>>, vector<8x128xf32>
    %159 = arith.truncf %152 : vector<8x32xf32> to vector<8x32xbf16>
    %c0_53 = arith.constant 0 : index
    %c0_54 = arith.constant 0 : index
    %160 = vector.load %arg4[%c0_53, %c0_54] : memref<32x128xbf16, #tpu.memory_space<vmem>>, vector<32x128xbf16>
    %cst_55 = arith.constant dense<0.000000e+00> : vector<8x128xf32>
    %161 = tpu.matmul %159, %160, %cst_55 {dimension_numbers = #tpu.dot_dimension_numbers<[1], [0], [0], [1], [0, 0, 1, 1], [], []>} : vector<8x32xbf16>, vector<32x128xbf16>, vector<8x128xf32> -> vector<8x128xf32>
    %162 = arith.addf %158, %161 : vector<8x128xf32>
    %163 = vector.extract_strided_slice %162 {offsets = [0, 0], sizes = [8, 32], strides = [1, 1]} : vector<8x128xf32> to vector<8x32xf32>
    %164 = arith.negf %163 : vector<8x32xf32>
    %165 = math.exp %164 : vector<8x32xf32>
    %cst_56 = arith.constant 1.000000e+00 : f32
    %166 = vector.broadcast %cst_56 : f32 to vector<8x32xf32>
    %167 = arith.addf %166, %165 : vector<8x32xf32>
    %168 = arith.divf %166, %167 : vector<8x32xf32>
    %169 = vector.extract_strided_slice %162 {offsets = [0, 32], sizes = [8, 32], strides = [1, 1]} : vector<8x128xf32> to vector<8x32xf32>
    %170 = arith.negf %169 : vector<8x32xf32>
    %171 = math.exp %170 : vector<8x32xf32>
    %cst_57 = arith.constant 1.000000e+00 : f32
    %172 = vector.broadcast %cst_57 : f32 to vector<8x32xf32>
    %173 = arith.addf %172, %171 : vector<8x32xf32>
    %174 = arith.divf %172, %173 : vector<8x32xf32>
    %175 = vector.extract_strided_slice %162 {offsets = [0, 64], sizes = [8, 32], strides = [1, 1]} : vector<8x128xf32> to vector<8x32xf32>
    %176 = math.tanh %175 : vector<8x32xf32>
    %177 = vector.extract_strided_slice %162 {offsets = [0, 96], sizes = [8, 32], strides = [1, 1]} : vector<8x128xf32> to vector<8x32xf32>
    %178 = arith.negf %177 : vector<8x32xf32>
    %179 = math.exp %178 : vector<8x32xf32>
    %cst_58 = arith.constant 1.000000e+00 : f32
    %180 = vector.broadcast %cst_58 : f32 to vector<8x32xf32>
    %181 = arith.addf %180, %179 : vector<8x32xf32>
    %182 = arith.divf %180, %181 : vector<8x32xf32>
    %183 = arith.mulf %174, %150 : vector<8x32xf32>
    %184 = arith.mulf %168, %176 : vector<8x32xf32>
    %185 = arith.addf %183, %184 : vector<8x32xf32>
    %186 = math.tanh %185 : vector<8x32xf32>
    %187 = arith.mulf %182, %186 : vector<8x32xf32>
    %188 = arith.index_cast %156 : i32 to index
    %c0_59 = arith.constant 0 : index
    %189 = vector.load %arg14[%188, %c0_59] : memref<64x32xf32, #tpu.memory_space<vmem>>, vector<8x32xf32>
    tpu.vector_store %arg14[%188, %c0_59], %187 {strides = array<i32>} : memref<64x32xf32, #tpu.memory_space<vmem>>, vector<8x32xf32>,
    %c5_i32 = arith.constant 5 : i32
    %c8_i32_60 = arith.constant 8 : i32
    %190 = arith.muli %c5_i32, %c8_i32_60 : i32
    %191 = tpu.assume_multiple %190, 8 : i32
    %192 = arith.index_cast %191 : i32 to index
    %c0_61 = arith.constant 0 : index
    %193 = vector.load %arg13[%192, %c0_61] : memref<64x128xf32, #tpu.memory_space<vmem>>, vector<8x128xf32>
    %194 = arith.truncf %187 : vector<8x32xf32> to vector<8x32xbf16>
    %c0_62 = arith.constant 0 : index
    %c0_63 = arith.constant 0 : index
    %195 = vector.load %arg4[%c0_62, %c0_63] : memref<32x128xbf16, #tpu.memory_space<vmem>>, vector<32x128xbf16>
    %cst_64 = arith.constant dense<0.000000e+00> : vector<8x128xf32>
    %196 = tpu.matmul %194, %195, %cst_64 {dimension_numbers = #tpu.dot_dimension_numbers<[1], [0], [0], [1], [0, 0, 1, 1], [], []>} : vector<8x32xbf16>, vector<32x128xbf16>, vector<8x128xf32> -> vector<8x128xf32>
    %197 = arith.addf %193, %196 : vector<8x128xf32>
    %198 = vector.extract_strided_slice %197 {offsets = [0, 0], sizes = [8, 32], strides = [1, 1]} : vector<8x128xf32> to vector<8x32xf32>
    %199 = arith.negf %198 : vector<8x32xf32>
    %200 = math.exp %199 : vector<8x32xf32>
    %cst_65 = arith.constant 1.000000e+00 : f32
    %201 = vector.broadcast %cst_65 : f32 to vector<8x32xf32>
    %202 = arith.addf %201, %200 : vector<8x32xf32>
    %203 = arith.divf %201, %202 : vector<8x32xf32>
    %204 = vector.extract_strided_slice %197 {offsets = [0, 32], sizes = [8, 32], strides = [1, 1]} : vector<8x128xf32> to vector<8x32xf32>
    %205 = arith.negf %204 : vector<8x32xf32>
    %206 = math.exp %205 : vector<8x32xf32>
    %cst_66 = arith.constant 1.000000e+00 : f32
    %207 = vector.broadcast %cst_66 : f32 to vector<8x32xf32>
    %208 = arith.addf %207, %206 : vector<8x32xf32>
    %209 = arith.divf %207, %208 : vector<8x32xf32>
    %210 = vector.extract_strided_slice %197 {offsets = [0, 64], sizes = [8, 32], strides = [1, 1]} : vector<8x128xf32> to vector<8x32xf32>
    %211 = math.tanh %210 : vector<8x32xf32>
    %212 = vector.extract_strided_slice %197 {offsets = [0, 96], sizes = [8, 32], strides = [1, 1]} : vector<8x128xf32> to vector<8x32xf32>
    %213 = arith.negf %212 : vector<8x32xf32>
    %214 = math.exp %213 : vector<8x32xf32>
    %cst_67 = arith.constant 1.000000e+00 : f32
    %215 = vector.broadcast %cst_67 : f32 to vector<8x32xf32>
    %216 = arith.addf %215, %214 : vector<8x32xf32>
    %217 = arith.divf %215, %216 : vector<8x32xf32>
    %218 = arith.mulf %209, %185 : vector<8x32xf32>
    %219 = arith.mulf %203, %211 : vector<8x32xf32>
    %220 = arith.addf %218, %219 : vector<8x32xf32>
    %221 = math.tanh %220 : vector<8x32xf32>
    %222 = arith.mulf %217, %221 : vector<8x32xf32>
    %223 = arith.index_cast %191 : i32 to index
    %c0_68 = arith.constant 0 : index
    %224 = vector.load %arg14[%223, %c0_68] : memref<64x32xf32, #tpu.memory_space<vmem>>, vector<8x32xf32>
    tpu.vector_store %arg14[%223, %c0_68], %222 {strides = array<i32>} : memref<64x32xf32, #tpu.memory_space<vmem>>, vector<8x32xf32>,
    %c6_i32 = arith.constant 6 : i32
    %c8_i32_69 = arith.constant 8 : i32
    %225 = arith.muli %c6_i32, %c8_i32_69 : i32
    %226 = tpu.assume_multiple %225, 8 : i32
    %227 = arith.index_cast %226 : i32 to index
    %c0_70 = arith.constant 0 : index
    %228 = vector.load %arg13[%227, %c0_70] : memref<64x128xf32, #tpu.memory_space<vmem>>, vector<8x128xf32>
    %229 = arith.truncf %222 : vector<8x32xf32> to vector<8x32xbf16>
    %c0_71 = arith.constant 0 : index
    %c0_72 = arith.constant 0 : index
    %230 = vector.load %arg4[%c0_71, %c0_72] : memref<32x128xbf16, #tpu.memory_space<vmem>>, vector<32x128xbf16>
    %cst_73 = arith.constant dense<0.000000e+00> : vector<8x128xf32>
    %231 = tpu.matmul %229, %230, %cst_73 {dimension_numbers = #tpu.dot_dimension_numbers<[1], [0], [0], [1], [0, 0, 1, 1], [], []>} : vector<8x32xbf16>, vector<32x128xbf16>, vector<8x128xf32> -> vector<8x128xf32>
    %232 = arith.addf %228, %231 : vector<8x128xf32>
    %233 = vector.extract_strided_slice %232 {offsets = [0, 0], sizes = [8, 32], strides = [1, 1]} : vector<8x128xf32> to vector<8x32xf32>
    %234 = arith.negf %233 : vector<8x32xf32>
    %235 = math.exp %234 : vector<8x32xf32>
    %cst_74 = arith.constant 1.000000e+00 : f32
    %236 = vector.broadcast %cst_74 : f32 to vector<8x32xf32>
    %237 = arith.addf %236, %235 : vector<8x32xf32>
    %238 = arith.divf %236, %237 : vector<8x32xf32>
    %239 = vector.extract_strided_slice %232 {offsets = [0, 32], sizes = [8, 32], strides = [1, 1]} : vector<8x128xf32> to vector<8x32xf32>
    %240 = arith.negf %239 : vector<8x32xf32>
    %241 = math.exp %240 : vector<8x32xf32>
    %cst_75 = arith.constant 1.000000e+00 : f32
    %242 = vector.broadcast %cst_75 : f32 to vector<8x32xf32>
    %243 = arith.addf %242, %241 : vector<8x32xf32>
    %244 = arith.divf %242, %243 : vector<8x32xf32>
    %245 = vector.extract_strided_slice %232 {offsets = [0, 64], sizes = [8, 32], strides = [1, 1]} : vector<8x128xf32> to vector<8x32xf32>
    %246 = math.tanh %245 : vector<8x32xf32>
    %247 = vector.extract_strided_slice %232 {offsets = [0, 96], sizes = [8, 32], strides = [1, 1]} : vector<8x128xf32> to vector<8x32xf32>
    %248 = arith.negf %247 : vector<8x32xf32>
    %249 = math.exp %248 : vector<8x32xf32>
    %cst_76 = arith.constant 1.000000e+00 : f32
    %250 = vector.broadcast %cst_76 : f32 to vector<8x32xf32>
    %251 = arith.addf %250, %249 : vector<8x32xf32>
    %252 = arith.divf %250, %251 : vector<8x32xf32>
    %253 = arith.mulf %244, %220 : vector<8x32xf32>
    %254 = arith.mulf %238, %246 : vector<8x32xf32>
    %255 = arith.addf %253, %254 : vector<8x32xf32>
    %256 = math.tanh %255 : vector<8x32xf32>
    %257 = arith.mulf %252, %256 : vector<8x32xf32>
    %258 = arith.index_cast %226 : i32 to index
    %c0_77 = arith.constant 0 : index
    %259 = vector.load %arg14[%258, %c0_77] : memref<64x32xf32, #tpu.memory_space<vmem>>, vector<8x32xf32>
    tpu.vector_store %arg14[%258, %c0_77], %257 {strides = array<i32>} : memref<64x32xf32, #tpu.memory_space<vmem>>, vector<8x32xf32>,
    %c7_i32 = arith.constant 7 : i32
    %c8_i32_78 = arith.constant 8 : i32
    %260 = arith.muli %c7_i32, %c8_i32_78 : i32
    %261 = tpu.assume_multiple %260, 8 : i32
    %262 = arith.index_cast %261 : i32 to index
    %c0_79 = arith.constant 0 : index
    %263 = vector.load %arg13[%262, %c0_79] : memref<64x128xf32, #tpu.memory_space<vmem>>, vector<8x128xf32>
    %264 = arith.truncf %257 : vector<8x32xf32> to vector<8x32xbf16>
    %c0_80 = arith.constant 0 : index
    %c0_81 = arith.constant 0 : index
    %265 = vector.load %arg4[%c0_80, %c0_81] : memref<32x128xbf16, #tpu.memory_space<vmem>>, vector<32x128xbf16>
    %cst_82 = arith.constant dense<0.000000e+00> : vector<8x128xf32>
    %266 = tpu.matmul %264, %265, %cst_82 {dimension_numbers = #tpu.dot_dimension_numbers<[1], [0], [0], [1], [0, 0, 1, 1], [], []>} : vector<8x32xbf16>, vector<32x128xbf16>, vector<8x128xf32> -> vector<8x128xf32>
    %267 = arith.addf %263, %266 : vector<8x128xf32>
    %268 = vector.extract_strided_slice %267 {offsets = [0, 0], sizes = [8, 32], strides = [1, 1]} : vector<8x128xf32> to vector<8x32xf32>
    %269 = arith.negf %268 : vector<8x32xf32>
    %270 = math.exp %269 : vector<8x32xf32>
    %cst_83 = arith.constant 1.000000e+00 : f32
    %271 = vector.broadcast %cst_83 : f32 to vector<8x32xf32>
    %272 = arith.addf %271, %270 : vector<8x32xf32>
    %273 = arith.divf %271, %272 : vector<8x32xf32>
    %274 = vector.extract_strided_slice %267 {offsets = [0, 32], sizes = [8, 32], strides = [1, 1]} : vector<8x128xf32> to vector<8x32xf32>
    %275 = arith.negf %274 : vector<8x32xf32>
    %276 = math.exp %275 : vector<8x32xf32>
    %cst_84 = arith.constant 1.000000e+00 : f32
    %277 = vector.broadcast %cst_84 : f32 to vector<8x32xf32>
    %278 = arith.addf %277, %276 : vector<8x32xf32>
    %279 = arith.divf %277, %278 : vector<8x32xf32>
    %280 = vector.extract_strided_slice %267 {offsets = [0, 64], sizes = [8, 32], strides = [1, 1]} : vector<8x128xf32> to vector<8x32xf32>
    %281 = math.tanh %280 : vector<8x32xf32>
    %282 = vector.extract_strided_slice %267 {offsets = [0, 96], sizes = [8, 32], strides = [1, 1]} : vector<8x128xf32> to vector<8x32xf32>
    %283 = arith.negf %282 : vector<8x32xf32>
    %284 = math.exp %283 : vector<8x32xf32>
    %cst_85 = arith.constant 1.000000e+00 : f32
    %285 = vector.broadcast %cst_85 : f32 to vector<8x32xf32>
    %286 = arith.addf %285, %284 : vector<8x32xf32>
    %287 = arith.divf %285, %286 : vector<8x32xf32>
    %288 = arith.mulf %279, %255 : vector<8x32xf32>
    %289 = arith.mulf %273, %281 : vector<8x32xf32>
    %290 = arith.addf %288, %289 : vector<8x32xf32>
    %291 = math.tanh %290 : vector<8x32xf32>
    %292 = arith.mulf %287, %291 : vector<8x32xf32>
    %293 = arith.index_cast %261 : i32 to index
    %c0_86 = arith.constant 0 : index
    %294 = vector.load %arg14[%293, %c0_86] : memref<64x32xf32, #tpu.memory_space<vmem>>, vector<8x32xf32>
    tpu.vector_store %arg14[%293, %c0_86], %292 {strides = array<i32>} : memref<64x32xf32, #tpu.memory_space<vmem>>, vector<8x32xf32>,
    %c8_i32_87 = arith.constant 8 : i32
    %c0_88 = arith.constant 0 : index
    %c0_89 = arith.constant 0 : index
    %c0_90 = arith.constant 0 : index
    %295 = vector.load %arg15[%c0_88, %c0_89, %c0_90] : memref<2x8x32xf32, #tpu.memory_space<vmem>>, vector<1x8x32xf32>
    %296 = vector.shape_cast %295 : vector<1x8x32xf32> to vector<8x32xf32>
    %297 = vector.shape_cast %292 : vector<8x32xf32> to vector<1x8x32xf32>
    tpu.vector_store %arg15[%c0_88, %c0_89, %c0_90], %297 {strides = array<i32>} : memref<2x8x32xf32, #tpu.memory_space<vmem>>, vector<1x8x32xf32>,
    %c0_91 = arith.constant 0 : index
    %c0_92 = arith.constant 0 : index
    %c0_93 = arith.constant 0 : index
    %298 = vector.load %arg16[%c0_91, %c0_92, %c0_93] : memref<2x8x32xf32, #tpu.memory_space<vmem>>, vector<1x8x32xf32>
    %299 = vector.shape_cast %298 : vector<1x8x32xf32> to vector<8x32xf32>
    %300 = vector.shape_cast %290 : vector<8x32xf32> to vector<1x8x32xf32>
    tpu.vector_store %arg16[%c0_91, %c0_92, %c0_93], %300 {strides = array<i32>} : memref<2x8x32xf32, #tpu.memory_space<vmem>>, vector<1x8x32xf32>,
    %c0_94 = arith.constant 0 : index
    %c0_95 = arith.constant 0 : index
    %301 = vector.load %arg14[%c0_94, %c0_95] : memref<64x32xf32, #tpu.memory_space<vmem>>, vector<64x32xf32>
    %c0_96 = arith.constant 0 : index
    %c0_97 = arith.constant 0 : index
    %302 = vector.load %arg8[%c0_96, %c0_97] : memref<1x128xf32, #tpu.memory_space<vmem>>, vector<1x128xf32>
    %303 = arith.truncf %301 : vector<64x32xf32> to vector<64x32xbf16>
    %c0_98 = arith.constant 0 : index
    %c0_99 = arith.constant 0 : index
    %304 = vector.load %arg6[%c0_98, %c0_99] : memref<32x128xbf16, #tpu.memory_space<vmem>>, vector<32x128xbf16>
    %cst_100 = arith.constant dense<0.000000e+00> : vector<64x128xf32>
    %305 = tpu.matmul %303, %304, %cst_100 {dimension_numbers = #tpu.dot_dimension_numbers<[1], [0], [0], [1], [0, 0, 1, 1], [], []>} : vector<64x32xbf16>, vector<32x128xbf16>, vector<64x128xf32> -> vector<64x128xf32>
    %306 = vector.broadcast %302 : vector<1x128xf32> to vector<64x128xf32>
    %307 = arith.addf %305, %306 : vector<64x128xf32>
    %c0_101 = arith.constant 0 : index
    %c0_102 = arith.constant 0 : index
    %308 = vector.load %arg13[%c0_101, %c0_102] : memref<64x128xf32, #tpu.memory_space<vmem>>, vector<64x128xf32>
    tpu.vector_store %arg13[%c0_101, %c0_102], %307 {strides = array<i32>} : memref<64x128xf32, #tpu.memory_space<vmem>>, vector<64x128xf32>,
    %c1 = arith.constant 1 : index
    %c0_103 = arith.constant 0 : index
    %c0_104 = arith.constant 0 : index
    %309 = vector.load %arg15[%c1, %c0_103, %c0_104] : memref<2x8x32xf32, #tpu.memory_space<vmem>>, vector<1x8x32xf32>
    %310 = vector.shape_cast %309 : vector<1x8x32xf32> to vector<8x32xf32>
    %c1_105 = arith.constant 1 : index
    %c0_106 = arith.constant 0 : index
    %c0_107 = arith.constant 0 : index
    %311 = vector.load %arg16[%c1_105, %c0_106, %c0_107] : memref<2x8x32xf32, #tpu.memory_space<vmem>>, vector<1x8x32xf32>
    %312 = vector.shape_cast %311 : vector<1x8x32xf32> to vector<8x32xf32>
    %c0_i32_108 = arith.constant 0 : i32
    %c8_i32_109 = arith.constant 8 : i32
    %313 = arith.muli %c0_i32_108, %c8_i32_109 : i32
    %314 = tpu.assume_multiple %313, 8 : i32
    %315 = arith.index_cast %314 : i32 to index
    %c0_110 = arith.constant 0 : index
    %316 = vector.load %arg13[%315, %c0_110] : memref<64x128xf32, #tpu.memory_space<vmem>>, vector<8x128xf32>
    %317 = arith.truncf %310 : vector<8x32xf32> to vector<8x32xbf16>
    %c0_111 = arith.constant 0 : index
    %c0_112 = arith.constant 0 : index
    %318 = vector.load %arg7[%c0_111, %c0_112] : memref<32x128xbf16, #tpu.memory_space<vmem>>, vector<32x128xbf16>
    %cst_113 = arith.constant dense<0.000000e+00> : vector<8x128xf32>
    %319 = tpu.matmul %317, %318, %cst_113 {dimension_numbers = #tpu.dot_dimension_numbers<[1], [0], [0], [1], [0, 0, 1, 1], [], []>} : vector<8x32xbf16>, vector<32x128xbf16>, vector<8x128xf32> -> vector<8x128xf32>
    %320 = arith.addf %316, %319 : vector<8x128xf32>
    %321 = vector.extract_strided_slice %320 {offsets = [0, 0], sizes = [8, 32], strides = [1, 1]} : vector<8x128xf32> to vector<8x32xf32>
    %322 = arith.negf %321 : vector<8x32xf32>
    %323 = math.exp %322 : vector<8x32xf32>
    %cst_114 = arith.constant 1.000000e+00 : f32
    %324 = vector.broadcast %cst_114 : f32 to vector<8x32xf32>
    %325 = arith.addf %324, %323 : vector<8x32xf32>
    %326 = arith.divf %324, %325 : vector<8x32xf32>
    %327 = vector.extract_strided_slice %320 {offsets = [0, 32], sizes = [8, 32], strides = [1, 1]} : vector<8x128xf32> to vector<8x32xf32>
    %328 = arith.negf %327 : vector<8x32xf32>
    %329 = math.exp %328 : vector<8x32xf32>
    %cst_115 = arith.constant 1.000000e+00 : f32
    %330 = vector.broadcast %cst_115 : f32 to vector<8x32xf32>
    %331 = arith.addf %330, %329 : vector<8x32xf32>
    %332 = arith.divf %330, %331 : vector<8x32xf32>
    %333 = vector.extract_strided_slice %320 {offsets = [0, 64], sizes = [8, 32], strides = [1, 1]} : vector<8x128xf32> to vector<8x32xf32>
    %334 = math.tanh %333 : vector<8x32xf32>
    %335 = vector.extract_strided_slice %320 {offsets = [0, 96], sizes = [8, 32], strides = [1, 1]} : vector<8x128xf32> to vector<8x32xf32>
    %336 = arith.negf %335 : vector<8x32xf32>
    %337 = math.exp %336 : vector<8x32xf32>
    %cst_116 = arith.constant 1.000000e+00 : f32
    %338 = vector.broadcast %cst_116 : f32 to vector<8x32xf32>
    %339 = arith.addf %338, %337 : vector<8x32xf32>
    %340 = arith.divf %338, %339 : vector<8x32xf32>
    %341 = arith.mulf %332, %312 : vector<8x32xf32>
    %342 = arith.mulf %326, %334 : vector<8x32xf32>
    %343 = arith.addf %341, %342 : vector<8x32xf32>
    %344 = math.tanh %343 : vector<8x32xf32>
    %345 = arith.mulf %340, %344 : vector<8x32xf32>
    %c1_i32_117 = arith.constant 1 : i32
    %c8_i32_118 = arith.constant 8 : i32
    %346 = arith.muli %c1_i32_117, %c8_i32_118 : i32
    %347 = tpu.assume_multiple %346, 8 : i32
    %348 = arith.index_cast %347 : i32 to index
    %c0_119 = arith.constant 0 : index
    %349 = vector.load %arg13[%348, %c0_119] : memref<64x128xf32, #tpu.memory_space<vmem>>, vector<8x128xf32>
    %350 = arith.truncf %345 : vector<8x32xf32> to vector<8x32xbf16>
    %c0_120 = arith.constant 0 : index
    %c0_121 = arith.constant 0 : index
    %351 = vector.load %arg7[%c0_120, %c0_121] : memref<32x128xbf16, #tpu.memory_space<vmem>>, vector<32x128xbf16>
    %cst_122 = arith.constant dense<0.000000e+00> : vector<8x128xf32>
    %352 = tpu.matmul %350, %351, %cst_122 {dimension_numbers = #tpu.dot_dimension_numbers<[1], [0], [0], [1], [0, 0, 1, 1], [], []>} : vector<8x32xbf16>, vector<32x128xbf16>, vector<8x128xf32> -> vector<8x128xf32>
    %353 = arith.addf %349, %352 : vector<8x128xf32>
    %354 = vector.extract_strided_slice %353 {offsets = [0, 0], sizes = [8, 32], strides = [1, 1]} : vector<8x128xf32> to vector<8x32xf32>
    %355 = arith.negf %354 : vector<8x32xf32>
    %356 = math.exp %355 : vector<8x32xf32>
    %cst_123 = arith.constant 1.000000e+00 : f32
    %357 = vector.broadcast %cst_123 : f32 to vector<8x32xf32>
    %358 = arith.addf %357, %356 : vector<8x32xf32>
    %359 = arith.divf %357, %358 : vector<8x32xf32>
    %360 = vector.extract_strided_slice %353 {offsets = [0, 32], sizes = [8, 32], strides = [1, 1]} : vector<8x128xf32> to vector<8x32xf32>
    %361 = arith.negf %360 : vector<8x32xf32>
    %362 = math.exp %361 : vector<8x32xf32>
    %cst_124 = arith.constant 1.000000e+00 : f32
    %363 = vector.broadcast %cst_124 : f32 to vector<8x32xf32>
    %364 = arith.addf %363, %362 : vector<8x32xf32>
    %365 = arith.divf %363, %364 : vector<8x32xf32>
    %366 = vector.extract_strided_slice %353 {offsets = [0, 64], sizes = [8, 32], strides = [1, 1]} : vector<8x128xf32> to vector<8x32xf32>
    %367 = math.tanh %366 : vector<8x32xf32>
    %368 = vector.extract_strided_slice %353 {offsets = [0, 96], sizes = [8, 32], strides = [1, 1]} : vector<8x128xf32> to vector<8x32xf32>
    %369 = arith.negf %368 : vector<8x32xf32>
    %370 = math.exp %369 : vector<8x32xf32>
    %cst_125 = arith.constant 1.000000e+00 : f32
    %371 = vector.broadcast %cst_125 : f32 to vector<8x32xf32>
    %372 = arith.addf %371, %370 : vector<8x32xf32>
    %373 = arith.divf %371, %372 : vector<8x32xf32>
    %374 = arith.mulf %365, %343 : vector<8x32xf32>
    %375 = arith.mulf %359, %367 : vector<8x32xf32>
    %376 = arith.addf %374, %375 : vector<8x32xf32>
    %377 = math.tanh %376 : vector<8x32xf32>
    %378 = arith.mulf %373, %377 : vector<8x32xf32>
    %c2_i32_126 = arith.constant 2 : i32
    %c8_i32_127 = arith.constant 8 : i32
    %379 = arith.muli %c2_i32_126, %c8_i32_127 : i32
    %380 = tpu.assume_multiple %379, 8 : i32
    %381 = arith.index_cast %380 : i32 to index
    %c0_128 = arith.constant 0 : index
    %382 = vector.load %arg13[%381, %c0_128] : memref<64x128xf32, #tpu.memory_space<vmem>>, vector<8x128xf32>
    %383 = arith.truncf %378 : vector<8x32xf32> to vector<8x32xbf16>
    %c0_129 = arith.constant 0 : index
    %c0_130 = arith.constant 0 : index
    %384 = vector.load %arg7[%c0_129, %c0_130] : memref<32x128xbf16, #tpu.memory_space<vmem>>, vector<32x128xbf16>
    %cst_131 = arith.constant dense<0.000000e+00> : vector<8x128xf32>
    %385 = tpu.matmul %383, %384, %cst_131 {dimension_numbers = #tpu.dot_dimension_numbers<[1], [0], [0], [1], [0, 0, 1, 1], [], []>} : vector<8x32xbf16>, vector<32x128xbf16>, vector<8x128xf32> -> vector<8x128xf32>
    %386 = arith.addf %382, %385 : vector<8x128xf32>
    %387 = vector.extract_strided_slice %386 {offsets = [0, 0], sizes = [8, 32], strides = [1, 1]} : vector<8x128xf32> to vector<8x32xf32>
    %388 = arith.negf %387 : vector<8x32xf32>
    %389 = math.exp %388 : vector<8x32xf32>
    %cst_132 = arith.constant 1.000000e+00 : f32
    %390 = vector.broadcast %cst_132 : f32 to vector<8x32xf32>
    %391 = arith.addf %390, %389 : vector<8x32xf32>
    %392 = arith.divf %390, %391 : vector<8x32xf32>
    %393 = vector.extract_strided_slice %386 {offsets = [0, 32], sizes = [8, 32], strides = [1, 1]} : vector<8x128xf32> to vector<8x32xf32>
    %394 = arith.negf %393 : vector<8x32xf32>
    %395 = math.exp %394 : vector<8x32xf32>
    %cst_133 = arith.constant 1.000000e+00 : f32
    %396 = vector.broadcast %cst_133 : f32 to vector<8x32xf32>
    %397 = arith.addf %396, %395 : vector<8x32xf32>
    %398 = arith.divf %396, %397 : vector<8x32xf32>
    %399 = vector.extract_strided_slice %386 {offsets = [0, 64], sizes = [8, 32], strides = [1, 1]} : vector<8x128xf32> to vector<8x32xf32>
    %400 = math.tanh %399 : vector<8x32xf32>
    %401 = vector.extract_strided_slice %386 {offsets = [0, 96], sizes = [8, 32], strides = [1, 1]} : vector<8x128xf32> to vector<8x32xf32>
    %402 = arith.negf %401 : vector<8x32xf32>
    %403 = math.exp %402 : vector<8x32xf32>
    %cst_134 = arith.constant 1.000000e+00 : f32
    %404 = vector.broadcast %cst_134 : f32 to vector<8x32xf32>
    %405 = arith.addf %404, %403 : vector<8x32xf32>
    %406 = arith.divf %404, %405 : vector<8x32xf32>
    %407 = arith.mulf %398, %376 : vector<8x32xf32>
    %408 = arith.mulf %392, %400 : vector<8x32xf32>
    %409 = arith.addf %407, %408 : vector<8x32xf32>
    %410 = math.tanh %409 : vector<8x32xf32>
    %411 = arith.mulf %406, %410 : vector<8x32xf32>
    %c3_i32_135 = arith.constant 3 : i32
    %c8_i32_136 = arith.constant 8 : i32
    %412 = arith.muli %c3_i32_135, %c8_i32_136 : i32
    %413 = tpu.assume_multiple %412, 8 : i32
    %414 = arith.index_cast %413 : i32 to index
    %c0_137 = arith.constant 0 : index
    %415 = vector.load %arg13[%414, %c0_137] : memref<64x128xf32, #tpu.memory_space<vmem>>, vector<8x128xf32>
    %416 = arith.truncf %411 : vector<8x32xf32> to vector<8x32xbf16>
    %c0_138 = arith.constant 0 : index
    %c0_139 = arith.constant 0 : index
    %417 = vector.load %arg7[%c0_138, %c0_139] : memref<32x128xbf16, #tpu.memory_space<vmem>>, vector<32x128xbf16>
    %cst_140 = arith.constant dense<0.000000e+00> : vector<8x128xf32>
    %418 = tpu.matmul %416, %417, %cst_140 {dimension_numbers = #tpu.dot_dimension_numbers<[1], [0], [0], [1], [0, 0, 1, 1], [], []>} : vector<8x32xbf16>, vector<32x128xbf16>, vector<8x128xf32> -> vector<8x128xf32>
    %419 = arith.addf %415, %418 : vector<8x128xf32>
    %420 = vector.extract_strided_slice %419 {offsets = [0, 0], sizes = [8, 32], strides = [1, 1]} : vector<8x128xf32> to vector<8x32xf32>
    %421 = arith.negf %420 : vector<8x32xf32>
    %422 = math.exp %421 : vector<8x32xf32>
    %cst_141 = arith.constant 1.000000e+00 : f32
    %423 = vector.broadcast %cst_141 : f32 to vector<8x32xf32>
    %424 = arith.addf %423, %422 : vector<8x32xf32>
    %425 = arith.divf %423, %424 : vector<8x32xf32>
    %426 = vector.extract_strided_slice %419 {offsets = [0, 32], sizes = [8, 32], strides = [1, 1]} : vector<8x128xf32> to vector<8x32xf32>
    %427 = arith.negf %426 : vector<8x32xf32>
    %428 = math.exp %427 : vector<8x32xf32>
    %cst_142 = arith.constant 1.000000e+00 : f32
    %429 = vector.broadcast %cst_142 : f32 to vector<8x32xf32>
    %430 = arith.addf %429, %428 : vector<8x32xf32>
    %431 = arith.divf %429, %430 : vector<8x32xf32>
    %432 = vector.extract_strided_slice %419 {offsets = [0, 64], sizes = [8, 32], strides = [1, 1]} : vector<8x128xf32> to vector<8x32xf32>
    %433 = math.tanh %432 : vector<8x32xf32>
    %434 = vector.extract_strided_slice %419 {offsets = [0, 96], sizes = [8, 32], strides = [1, 1]} : vector<8x128xf32> to vector<8x32xf32>
    %435 = arith.negf %434 : vector<8x32xf32>
    %436 = math.exp %435 : vector<8x32xf32>
    %cst_143 = arith.constant 1.000000e+00 : f32
    %437 = vector.broadcast %cst_143 : f32 to vector<8x32xf32>
    %438 = arith.addf %437, %436 : vector<8x32xf32>
    %439 = arith.divf %437, %438 : vector<8x32xf32>
    %440 = arith.mulf %431, %409 : vector<8x32xf32>
    %441 = arith.mulf %425, %433 : vector<8x32xf32>
    %442 = arith.addf %440, %441 : vector<8x32xf32>
    %443 = math.tanh %442 : vector<8x32xf32>
    %444 = arith.mulf %439, %443 : vector<8x32xf32>
    %c4_i32_144 = arith.constant 4 : i32
    %c8_i32_145 = arith.constant 8 : i32
    %445 = arith.muli %c4_i32_144, %c8_i32_145 : i32
    %446 = tpu.assume_multiple %445, 8 : i32
    %447 = arith.index_cast %446 : i32 to index
    %c0_146 = arith.constant 0 : index
    %448 = vector.load %arg13[%447, %c0_146] : memref<64x128xf32, #tpu.memory_space<vmem>>, vector<8x128xf32>
    %449 = arith.truncf %444 : vector<8x32xf32> to vector<8x32xbf16>
    %c0_147 = arith.constant 0 : index
    %c0_148 = arith.constant 0 : index
    %450 = vector.load %arg7[%c0_147, %c0_148] : memref<32x128xbf16, #tpu.memory_space<vmem>>, vector<32x128xbf16>
    %cst_149 = arith.constant dense<0.000000e+00> : vector<8x128xf32>
    %451 = tpu.matmul %449, %450, %cst_149 {dimension_numbers = #tpu.dot_dimension_numbers<[1], [0], [0], [1], [0, 0, 1, 1], [], []>} : vector<8x32xbf16>, vector<32x128xbf16>, vector<8x128xf32> -> vector<8x128xf32>
    %452 = arith.addf %448, %451 : vector<8x128xf32>
    %453 = vector.extract_strided_slice %452 {offsets = [0, 0], sizes = [8, 32], strides = [1, 1]} : vector<8x128xf32> to vector<8x32xf32>
    %454 = arith.negf %453 : vector<8x32xf32>
    %455 = math.exp %454 : vector<8x32xf32>
    %cst_150 = arith.constant 1.000000e+00 : f32
    %456 = vector.broadcast %cst_150 : f32 to vector<8x32xf32>
    %457 = arith.addf %456, %455 : vector<8x32xf32>
    %458 = arith.divf %456, %457 : vector<8x32xf32>
    %459 = vector.extract_strided_slice %452 {offsets = [0, 32], sizes = [8, 32], strides = [1, 1]} : vector<8x128xf32> to vector<8x32xf32>
    %460 = arith.negf %459 : vector<8x32xf32>
    %461 = math.exp %460 : vector<8x32xf32>
    %cst_151 = arith.constant 1.000000e+00 : f32
    %462 = vector.broadcast %cst_151 : f32 to vector<8x32xf32>
    %463 = arith.addf %462, %461 : vector<8x32xf32>
    %464 = arith.divf %462, %463 : vector<8x32xf32>
    %465 = vector.extract_strided_slice %452 {offsets = [0, 64], sizes = [8, 32], strides = [1, 1]} : vector<8x128xf32> to vector<8x32xf32>
    %466 = math.tanh %465 : vector<8x32xf32>
    %467 = vector.extract_strided_slice %452 {offsets = [0, 96], sizes = [8, 32], strides = [1, 1]} : vector<8x128xf32> to vector<8x32xf32>
    %468 = arith.negf %467 : vector<8x32xf32>
    %469 = math.exp %468 : vector<8x32xf32>
    %cst_152 = arith.constant 1.000000e+00 : f32
    %470 = vector.broadcast %cst_152 : f32 to vector<8x32xf32>
    %471 = arith.addf %470, %469 : vector<8x32xf32>
    %472 = arith.divf %470, %471 : vector<8x32xf32>
    %473 = arith.mulf %464, %442 : vector<8x32xf32>
    %474 = arith.mulf %458, %466 : vector<8x32xf32>
    %475 = arith.addf %473, %474 : vector<8x32xf32>
    %476 = math.tanh %475 : vector<8x32xf32>
    %477 = arith.mulf %472, %476 : vector<8x32xf32>
    %c5_i32_153 = arith.constant 5 : i32
    %c8_i32_154 = arith.constant 8 : i32
    %478 = arith.muli %c5_i32_153, %c8_i32_154 : i32
    %479 = tpu.assume_multiple %478, 8 : i32
    %480 = arith.index_cast %479 : i32 to index
    %c0_155 = arith.constant 0 : index
    %481 = vector.load %arg13[%480, %c0_155] : memref<64x128xf32, #tpu.memory_space<vmem>>, vector<8x128xf32>
    %482 = arith.truncf %477 : vector<8x32xf32> to vector<8x32xbf16>
    %c0_156 = arith.constant 0 : index
    %c0_157 = arith.constant 0 : index
    %483 = vector.load %arg7[%c0_156, %c0_157] : memref<32x128xbf16, #tpu.memory_space<vmem>>, vector<32x128xbf16>
    %cst_158 = arith.constant dense<0.000000e+00> : vector<8x128xf32>
    %484 = tpu.matmul %482, %483, %cst_158 {dimension_numbers = #tpu.dot_dimension_numbers<[1], [0], [0], [1], [0, 0, 1, 1], [], []>} : vector<8x32xbf16>, vector<32x128xbf16>, vector<8x128xf32> -> vector<8x128xf32>
    %485 = arith.addf %481, %484 : vector<8x128xf32>
    %486 = vector.extract_strided_slice %485 {offsets = [0, 0], sizes = [8, 32], strides = [1, 1]} : vector<8x128xf32> to vector<8x32xf32>
    %487 = arith.negf %486 : vector<8x32xf32>
    %488 = math.exp %487 : vector<8x32xf32>
    %cst_159 = arith.constant 1.000000e+00 : f32
    %489 = vector.broadcast %cst_159 : f32 to vector<8x32xf32>
    %490 = arith.addf %489, %488 : vector<8x32xf32>
    %491 = arith.divf %489, %490 : vector<8x32xf32>
    %492 = vector.extract_strided_slice %485 {offsets = [0, 32], sizes = [8, 32], strides = [1, 1]} : vector<8x128xf32> to vector<8x32xf32>
    %493 = arith.negf %492 : vector<8x32xf32>
    %494 = math.exp %493 : vector<8x32xf32>
    %cst_160 = arith.constant 1.000000e+00 : f32
    %495 = vector.broadcast %cst_160 : f32 to vector<8x32xf32>
    %496 = arith.addf %495, %494 : vector<8x32xf32>
    %497 = arith.divf %495, %496 : vector<8x32xf32>
    %498 = vector.extract_strided_slice %485 {offsets = [0, 64], sizes = [8, 32], strides = [1, 1]} : vector<8x128xf32> to vector<8x32xf32>
    %499 = math.tanh %498 : vector<8x32xf32>
    %500 = vector.extract_strided_slice %485 {offsets = [0, 96], sizes = [8, 32], strides = [1, 1]} : vector<8x128xf32> to vector<8x32xf32>
    %501 = arith.negf %500 : vector<8x32xf32>
    %502 = math.exp %501 : vector<8x32xf32>
    %cst_161 = arith.constant 1.000000e+00 : f32
    %503 = vector.broadcast %cst_161 : f32 to vector<8x32xf32>
    %504 = arith.addf %503, %502 : vector<8x32xf32>
    %505 = arith.divf %503, %504 : vector<8x32xf32>
    %506 = arith.mulf %497, %475 : vector<8x32xf32>
    %507 = arith.mulf %491, %499 : vector<8x32xf32>
    %508 = arith.addf %506, %507 : vector<8x32xf32>
    %509 = math.tanh %508 : vector<8x32xf32>
    %510 = arith.mulf %505, %509 : vector<8x32xf32>
    %c6_i32_162 = arith.constant 6 : i32
    %c8_i32_163 = arith.constant 8 : i32
    %511 = arith.muli %c6_i32_162, %c8_i32_163 : i32
    %512 = tpu.assume_multiple %511, 8 : i32
    %513 = arith.index_cast %512 : i32 to index
    %c0_164 = arith.constant 0 : index
    %514 = vector.load %arg13[%513, %c0_164] : memref<64x128xf32, #tpu.memory_space<vmem>>, vector<8x128xf32>
    %515 = arith.truncf %510 : vector<8x32xf32> to vector<8x32xbf16>
    %c0_165 = arith.constant 0 : index
    %c0_166 = arith.constant 0 : index
    %516 = vector.load %arg7[%c0_165, %c0_166] : memref<32x128xbf16, #tpu.memory_space<vmem>>, vector<32x128xbf16>
    %cst_167 = arith.constant dense<0.000000e+00> : vector<8x128xf32>
    %517 = tpu.matmul %515, %516, %cst_167 {dimension_numbers = #tpu.dot_dimension_numbers<[1], [0], [0], [1], [0, 0, 1, 1], [], []>} : vector<8x32xbf16>, vector<32x128xbf16>, vector<8x128xf32> -> vector<8x128xf32>
    %518 = arith.addf %514, %517 : vector<8x128xf32>
    %519 = vector.extract_strided_slice %518 {offsets = [0, 0], sizes = [8, 32], strides = [1, 1]} : vector<8x128xf32> to vector<8x32xf32>
    %520 = arith.negf %519 : vector<8x32xf32>
    %521 = math.exp %520 : vector<8x32xf32>
    %cst_168 = arith.constant 1.000000e+00 : f32
    %522 = vector.broadcast %cst_168 : f32 to vector<8x32xf32>
    %523 = arith.addf %522, %521 : vector<8x32xf32>
    %524 = arith.divf %522, %523 : vector<8x32xf32>
    %525 = vector.extract_strided_slice %518 {offsets = [0, 32], sizes = [8, 32], strides = [1, 1]} : vector<8x128xf32> to vector<8x32xf32>
    %526 = arith.negf %525 : vector<8x32xf32>
    %527 = math.exp %526 : vector<8x32xf32>
    %cst_169 = arith.constant 1.000000e+00 : f32
    %528 = vector.broadcast %cst_169 : f32 to vector<8x32xf32>
    %529 = arith.addf %528, %527 : vector<8x32xf32>
    %530 = arith.divf %528, %529 : vector<8x32xf32>
    %531 = vector.extract_strided_slice %518 {offsets = [0, 64], sizes = [8, 32], strides = [1, 1]} : vector<8x128xf32> to vector<8x32xf32>
    %532 = math.tanh %531 : vector<8x32xf32>
    %533 = vector.extract_strided_slice %518 {offsets = [0, 96], sizes = [8, 32], strides = [1, 1]} : vector<8x128xf32> to vector<8x32xf32>
    %534 = arith.negf %533 : vector<8x32xf32>
    %535 = math.exp %534 : vector<8x32xf32>
    %cst_170 = arith.constant 1.000000e+00 : f32
    %536 = vector.broadcast %cst_170 : f32 to vector<8x32xf32>
    %537 = arith.addf %536, %535 : vector<8x32xf32>
    %538 = arith.divf %536, %537 : vector<8x32xf32>
    %539 = arith.mulf %530, %508 : vector<8x32xf32>
    %540 = arith.mulf %524, %532 : vector<8x32xf32>
    %541 = arith.addf %539, %540 : vector<8x32xf32>
    %542 = math.tanh %541 : vector<8x32xf32>
    %543 = arith.mulf %538, %542 : vector<8x32xf32>
    %c7_i32_171 = arith.constant 7 : i32
    %c8_i32_172 = arith.constant 8 : i32
    %544 = arith.muli %c7_i32_171, %c8_i32_172 : i32
    %545 = tpu.assume_multiple %544, 8 : i32
    %546 = arith.index_cast %545 : i32 to index
    %c0_173 = arith.constant 0 : index
    %547 = vector.load %arg13[%546, %c0_173] : memref<64x128xf32, #tpu.memory_space<vmem>>, vector<8x128xf32>
    %548 = arith.truncf %543 : vector<8x32xf32> to vector<8x32xbf16>
    %c0_174 = arith.constant 0 : index
    %c0_175 = arith.constant 0 : index
    %549 = vector.load %arg7[%c0_174, %c0_175] : memref<32x128xbf16, #tpu.memory_space<vmem>>, vector<32x128xbf16>
    %cst_176 = arith.constant dense<0.000000e+00> : vector<8x128xf32>
    %550 = tpu.matmul %548, %549, %cst_176 {dimension_numbers = #tpu.dot_dimension_numbers<[1], [0], [0], [1], [0, 0, 1, 1], [], []>} : vector<8x32xbf16>, vector<32x128xbf16>, vector<8x128xf32> -> vector<8x128xf32>
    %551 = arith.addf %547, %550 : vector<8x128xf32>
    %552 = vector.extract_strided_slice %551 {offsets = [0, 0], sizes = [8, 32], strides = [1, 1]} : vector<8x128xf32> to vector<8x32xf32>
    %553 = arith.negf %552 : vector<8x32xf32>
    %554 = math.exp %553 : vector<8x32xf32>
    %cst_177 = arith.constant 1.000000e+00 : f32
    %555 = vector.broadcast %cst_177 : f32 to vector<8x32xf32>
    %556 = arith.addf %555, %554 : vector<8x32xf32>
    %557 = arith.divf %555, %556 : vector<8x32xf32>
    %558 = vector.extract_strided_slice %551 {offsets = [0, 32], sizes = [8, 32], strides = [1, 1]} : vector<8x128xf32> to vector<8x32xf32>
    %559 = arith.negf %558 : vector<8x32xf32>
    %560 = math.exp %559 : vector<8x32xf32>
    %cst_178 = arith.constant 1.000000e+00 : f32
    %561 = vector.broadcast %cst_178 : f32 to vector<8x32xf32>
    %562 = arith.addf %561, %560 : vector<8x32xf32>
    %563 = arith.divf %561, %562 : vector<8x32xf32>
    %564 = vector.extract_strided_slice %551 {offsets = [0, 64], sizes = [8, 32], strides = [1, 1]} : vector<8x128xf32> to vector<8x32xf32>
    %565 = math.tanh %564 : vector<8x32xf32>
    %566 = vector.extract_strided_slice %551 {offsets = [0, 96], sizes = [8, 32], strides = [1, 1]} : vector<8x128xf32> to vector<8x32xf32>
    %567 = arith.negf %566 : vector<8x32xf32>
    %568 = math.exp %567 : vector<8x32xf32>
    %cst_179 = arith.constant 1.000000e+00 : f32
    %569 = vector.broadcast %cst_179 : f32 to vector<8x32xf32>
    %570 = arith.addf %569, %568 : vector<8x32xf32>
    %571 = arith.divf %569, %570 : vector<8x32xf32>
    %572 = arith.mulf %563, %541 : vector<8x32xf32>
    %573 = arith.mulf %557, %565 : vector<8x32xf32>
    %574 = arith.addf %572, %573 : vector<8x32xf32>
    %575 = math.tanh %574 : vector<8x32xf32>
    %576 = arith.mulf %571, %575 : vector<8x32xf32>
    %c8_i32_180 = arith.constant 8 : i32
    %c1_181 = arith.constant 1 : index
    %c0_182 = arith.constant 0 : index
    %c0_183 = arith.constant 0 : index
    %577 = vector.load %arg15[%c1_181, %c0_182, %c0_183] : memref<2x8x32xf32, #tpu.memory_space<vmem>>, vector<1x8x32xf32>
    %578 = vector.shape_cast %577 : vector<1x8x32xf32> to vector<8x32xf32>
    %579 = vector.shape_cast %576 : vector<8x32xf32> to vector<1x8x32xf32>
    tpu.vector_store %arg15[%c1_181, %c0_182, %c0_183], %579 {strides = array<i32>} : memref<2x8x32xf32, #tpu.memory_space<vmem>>, vector<1x8x32xf32>,
    %c1_184 = arith.constant 1 : index
    %c0_185 = arith.constant 0 : index
    %c0_186 = arith.constant 0 : index
    %580 = vector.load %arg16[%c1_184, %c0_185, %c0_186] : memref<2x8x32xf32, #tpu.memory_space<vmem>>, vector<1x8x32xf32>
    %581 = vector.shape_cast %580 : vector<1x8x32xf32> to vector<8x32xf32>
    %582 = vector.shape_cast %574 : vector<8x32xf32> to vector<1x8x32xf32>
    tpu.vector_store %arg16[%c1_184, %c0_185, %c0_186], %582 {strides = array<i32>} : memref<2x8x32xf32, #tpu.memory_space<vmem>>, vector<1x8x32xf32>,
    %c0_i32_187 = arith.constant 0 : i32
    %583 = arith.cmpi eq, %arg1, %c0_i32_187 : i32
    %584 = arith.extui %583 : i1 to i32
    %c0_i32_188 = arith.constant 0 : i32
    %585 = arith.cmpi ne, %584, %c0_i32_188 : i32
    scf.if %585 {
      %c1_189 = arith.constant 1 : index
      %c0_190 = arith.constant 0 : index
      %c0_191 = arith.constant 0 : index
      %586 = vector.load %arg15[%c1_189, %c0_190, %c0_191] : memref<2x8x32xf32, #tpu.memory_space<vmem>>, vector<1x8x32xf32>
      %587 = vector.shape_cast %586 : vector<1x8x32xf32> to vector<8x32xf32>
      %c0_192 = arith.constant 0 : index
      %c0_193 = arith.constant 0 : index
      %588 = vector.load %arg9[%c0_192, %c0_193] : memref<1x32xf32, #tpu.memory_space<vmem>>, vector<1x32xf32>
      %589 = vector.broadcast %588 : vector<1x32xf32> to vector<8x32xf32>
      %590 = arith.mulf %587, %589 : vector<8x32xf32>
      %cst_194 = arith.constant dense<0.000000e+00> : vector<8xf32>
      %591 = vector.multi_reduction <add>, %590, %cst_194 [1] : vector<8x32xf32> to vector<8xf32>
      %592 = vector.shape_cast %591 : vector<8xf32> to vector<8x1xf32>
      %c0_195 = arith.constant 0 : index
      %c0_196 = arith.constant 0 : index
      %593 = vector.load %arg10[%c0_195, %c0_196] : memref<1x1xf32, #tpu.memory_space<vmem>>, vector<1x1xf32>
      %594 = vector.broadcast %593 : vector<1x1xf32> to vector<8x1xf32>
      %595 = arith.addf %592, %594 : vector<8x1xf32>
      %c0_197 = arith.constant 0 : index
      %c0_198 = arith.constant 0 : index
      %596 = vector.load %arg11[%c0_197, %c0_198] : memref<1x1xf32, #tpu.memory_space<vmem>>, vector<1x1xf32>
      %597 = vector.broadcast %596 : vector<1x1xf32> to vector<8x1xf32>
      %598 = arith.mulf %597, %595 : vector<8x1xf32>
      %599 = arith.negf %598 : vector<8x1xf32>
      %600 = math.exp %599 : vector<8x1xf32>
      %cst_199 = arith.constant 1.000000e+00 : f32
      %601 = vector.broadcast %cst_199 : f32 to vector<8x1xf32>
      %602 = arith.addf %601, %600 : vector<8x1xf32>
      %603 = arith.divf %601, %602 : vector<8x1xf32>
      %604 = arith.mulf %595, %603 : vector<8x1xf32>
      %c0_200 = arith.constant 0 : index
      %c0_201 = arith.constant 0 : index
      %605 = vector.load %arg12[%c0_200, %c0_201] : memref<8x1xf32, #tpu.memory_space<vmem>>, vector<8x1xf32>
      tpu.vector_store %arg12[%c0_200, %c0_201], %604 {strides = array<i32>} : memref<8x1xf32, #tpu.memory_space<vmem>>, vector<8x1xf32>,
    } else {
    }
    return
  }
  func.func @transform_0(%arg0: i32, %arg1: i32) -> (i32, i32, i32) {
    %c0_i32 = arith.constant 0 : i32
    %c0_i32_0 = arith.constant 0 : i32
    return %arg1, %arg0, %c0_i32 : i32, i32, i32
  }
  func.func @transform_1(%arg0: i32, %arg1: i32) -> (i32, i32) {
    %c0_i32 = arith.constant 0 : i32
    %c0_i32_0 = arith.constant 0 : i32
    %c0_i32_1 = arith.constant 0 : i32
    return %c0_i32, %c0_i32_0 : i32, i32
  }
  func.func @transform_2(%arg0: i32, %arg1: i32) -> (i32, i32) {
    %c0_i32 = arith.constant 0 : i32
    %c0_i32_0 = arith.constant 0 : i32
    %c0_i32_1 = arith.constant 0 : i32
    return %c0_i32, %c0_i32_0 : i32, i32
  }
  func.func @transform_3(%arg0: i32, %arg1: i32) -> (i32, i32) {
    %c0_i32 = arith.constant 0 : i32
    %c0_i32_0 = arith.constant 0 : i32
    %c0_i32_1 = arith.constant 0 : i32
    return %c0_i32, %c0_i32_0 : i32, i32
  }
  func.func @transform_4(%arg0: i32, %arg1: i32) -> (i32, i32) {
    %c0_i32 = arith.constant 0 : i32
    %c0_i32_0 = arith.constant 0 : i32
    %c0_i32_1 = arith.constant 0 : i32
    return %c0_i32, %c0_i32_0 : i32, i32
  }
  func.func @transform_5(%arg0: i32, %arg1: i32) -> (i32, i32) {
    %c0_i32 = arith.constant 0 : i32
    %c0_i32_0 = arith.constant 0 : i32
    %c0_i32_1 = arith.constant 0 : i32
    return %c0_i32, %c0_i32_0 : i32, i32
  }
  func.func @transform_6(%arg0: i32, %arg1: i32) -> (i32, i32) {
    %c0_i32 = arith.constant 0 : i32
    %c0_i32_0 = arith.constant 0 : i32
    %c0_i32_1 = arith.constant 0 : i32
    return %c0_i32, %c0_i32_0 : i32, i32
  }
  func.func @transform_7(%arg0: i32, %arg1: i32) -> (i32, i32) {
    %c0_i32 = arith.constant 0 : i32
    %c0_i32_0 = arith.constant 0 : i32
    %c0_i32_1 = arith.constant 0 : i32
    return %c0_i32, %c0_i32_0 : i32, i32
  }
  func.func @transform_8(%arg0: i32, %arg1: i32) -> (i32, i32) {
    %c0_i32 = arith.constant 0 : i32
    %c0_i32_0 = arith.constant 0 : i32
    %c0_i32_1 = arith.constant 0 : i32
    return %c0_i32, %c0_i32_0 : i32, i32
  }
  func.func @transform_9(%arg0: i32, %arg1: i32) -> (i32, i32) {
    %c0_i32 = arith.constant 0 : i32
    %c0_i32_0 = arith.constant 0 : i32
    %c0_i32_1 = arith.constant 0 : i32
    return %c0_i32, %c0_i32_0 : i32, i32
  }
  func.func @transform_10(%arg0: i32, %arg1: i32) -> (i32, i32) {
    %c0_i32 = arith.constant 0 : i32
    %c0_i32_0 = arith.constant 0 : i32
    return %arg0, %c0_i32 : i32, i32
  }
}

</mosaic_0001>

<bundles_post_ra>
// kernel: lstm_model_forward.1
= control target key start
LH: loop header
LB: loop body
LE: loop exit
PB: predicated region body
PF: predicated region fallthrough
CT: control target
= control target key end

     0   :  { %vm44_vm0 = vcmask 261120   ;;  %v2175_v0 = vmov 0.0   ;;  %vm2176_vm1 = vmmov 0   ;;  %vm92_vm2 = vcmask 130048   ;;  %s2177_s24 = smov 64   ;;  %s2179_s25 = smov 96   ;;  %s2632_s1 = inlined_call_operand.vmem [shape: bf16[16,128], index: 1, kind: input, shape index: {}]   ;;  %s2633_s2 = inlined_call_operand.vmem [shape: bf16[32,128], index: 2, kind: input, shape index: {}]   ;;  %s2634_s0 = inlined_call_operand.vmem [shape: bf16[8,8,16], index: 0, kind: input, shape index: {}]   ;;  %s2635_s3 = inlined_call_operand.vmem [shape: f32[1,128], index: 3, kind: input, shape index: {}]   ;;  %s2636_s4 = inlined_call_operand.vmem [shape: bf16[32,128], index: 4, kind: input, shape index: {}]   ;;  %s2637_s5 = inlined_call_operand.vmem [shape: bf16[32,128], index: 5, kind: input, shape index: {}]   ;;  %s2638_s6 = inlined_call_operand.vmem [shape: f32[1,128], index: 6, kind: input, shape index: {}]   ;;  %s2639_s8 = inlined_call_operand.<no memory space> [shape: f32[1,1], index: 8, kind: input, shape index: {}]   ;;  %s2640_s9 = inlined_call_operand.<no memory space> [shape: f32[1,1], index: 9, kind: input, shape index: {}]   ;;  %s2641_s7 = inlined_call_operand.vmem [shape: f32[1,32], index: 7, kind: input, shape index: {}]   ;;  %s2642_s10 = inlined_call_operand.vmem [shape: f32[8,1], index: 10, kind: output, shape index: {}]  }
   0x1   :  { %1873 = vmatprep.subr.bf16.mxu1 %v2175_v0  ;;  %v2018_v1 = vld [vmem:[%s2632_s1] sm:$0xff]   ;;  %1877 = vmatprep.mubr.msk.bf16.mxu1 %vm2176_vm1, %v2175_v0  ;;  %45 = vst.msk [vmem:[#allocation4] sm:$0xff] %vm44_vm0, %v2175_v0  ;;  %46 = vst.msk [vmem:[#allocation4 + $0x8] sm:$0xff] %vm44_vm0, %v2175_v0  ;;  %v2021_v4 = vld [vmem:[%s2634_s0 + $0x8] sm:$0xff]   ;;  %vm1727_vm3 = vcmask 7168  }
   0x2   :  { %47 = vst.msk [vmem:[#allocation5] sm:$0xff] %vm44_vm0, %v2175_v0  ;;  %48 = vst.msk [vmem:[#allocation5 + $0x8] sm:$0xff] %vm44_vm0, %v2175_v0  ;;  %v2019_v2 = vld [vmem:[%s2633_s2] sm:$0xff]   ;;  %1863 = vmatprep.subr.bf16.mxu0 %v2018_v1  ;;  %v2022_v5 = vld [vmem:[%s2633_s2 + $0x8] sm:$0xff]  }
   0x3   :  { %v2020_v3 = vld [vmem:[%s2634_s0] sm:$0xff]   ;;  %1874 = vmatpush3.bf16.msra.mxu1 %v2019_v2  ;;  %1864 = vmatpush3.bf16.msra.mxu0 %v2018_v1  ;;  %v2024_v32 = vld [vmem:[%s2633_s2 + $0x8] sm:$0xff]   ;;  %v2026_v55 = vld [vmem:[%s2634_s0 + $0x10] sm:$0xff]  }
   0x4   :  { %1865 = vmatprep.mubr.msk.bf16.mxu0 %vm92_vm2, %v2020_v3  ;;  %1875 = vmatprep.subr.bf16.mxu1 %v2175_v0  ;;  %v2272_v8 = vld [vmem:[%s2635_s3] ss:$0 sm:$0xff]  ;;  %s2178_s3 = smov 32   ;;  %v2027_v56 = vld [vmem:[%s2634_s0 + $0x18] sm:$0xff]   ;;  %v2028_v57 = vld [vmem:[%s2633_s2 + $0x8] sm:$0xff]  }
   0x5   :  { %1889 = vmatprep.subr.bf16.mxu0 %v2175_v0  ;;  %v2023_v31 = vld [vmem:[%s2633_s2] sm:$0xff]  }
   0x6   :  { %1866 = vmatmul.mubr.msk.bf16.vlgmr.msra.gmra.mrb[0].mxu0 %vm92_vm2, %v2021_v4  ;;  %v2025_v54 = vld [vmem:[%s2633_s2] sm:$0xff]  }
   0x7   :  { %1876 = vmatpush3.bf16.msra.mxu1 %v2022_v5  ;;  %1890 = vmatpush3.bf16.msra.mxu0 %v2025_v54 }
   0x8   :  { %v178_v6 = vld [vmem:[#allocation4] sm:$0xff]  ;;  %1881 = vmatprep.subr.bf16.mxu1 %v2175_v0  ;;  %1869 = vmatprep.mubr.msk.bf16.mxu0 %vm92_vm2, %v2026_v55 }
   0x9   :  { %v181_v7 = vpack.c.bf16 %v178_v6, %v178_v6  ;;  %v179_v20 = vld [vmem:[#allocation5] sm:$0xff]  ;;  %1891 = vmatprep.subr.bf16.mxu0 %v2175_v0 }
   0xb   :  { %1878 = vmatmul.mubr.msk.bf16.vlgmr.msra.gmra.mrb[0].mxu1 %vm44_vm0, %v181_v7  ;;  %1892 = vmatpush3.bf16.msra.mxu0 %v2028_v57 }
   0xc   :  { %1885 = vmatprep.mubr.msk.bf16.mxu1 %vm2176_vm1, %v2175_v0  ;;  %1882 = vmatpush3.bf16.msra.mxu1 %v2023_v31 }
   0xd   :  { %1883 = vmatprep.subr.bf16.mxu1 %v2175_v0  ;;  %1905 = vmatprep.subr.bf16.mxu0 %v2175_v0 }
   0xe   :  { %1870 = vmatmul.mubr.msk.bf16.gmra.mrb[4].mxu0 %vm92_vm2, %v2027_v56 }
   0xf   :  { %1893 = vmatprep.mubr.msk.bf16.mxu0 %vm2176_vm1, %v2175_v0 }
  0x10   :  { %1884 = vmatpush3.bf16.msra.mxu1 %v2024_v32 }
  0x11   :  { %1897 = vmatprep.subr.bf16.mxu1 %v2175_v0 }
  0xd9   :  { %v2274_v9 = vpop.f32.mrb[0].mxu0 }
  0xda   :  { %v139_v10 = vpop.f32.mrb[1].mxu0  ;;  %v148_v4 = vadd.f32 %v2274_v9, %v2272_v8 }
  0xdb   :  { %v140_v11 = vadd.f32 %v2272_v8, %v139_v10  ;;  %v2277_v12 = vpop.f32.mrb[2].mxu0 }
  0xdc   :  { %v142_v13 = vpop.f32.mrb[3].mxu0 }
  0xdd   :  { %v143_v38 = vadd.f32 %v2272_v8, %v142_v13 }
  0xde   :  { %v236_v14 = vpop.f32.mrb[0].mxu1 }
  0xdf   :  { %v242_v15 = vadd.f32 %v236_v14, %v140_v11  ;;  %v1879_v16 = vpop.f32.mrb[1].mxu1 }
  0xe0   :  { %v239_v17 = vpop.f32.mrb[2].mxu1 }
  0xe1   :  { %2043 = vtanh.f32 %v242_v15  ;;  %v1880_v18 = vpop.f32.mrb[3].mxu1  ;;  %v1746_v21 = vmul.f32 -1.442695, %v242_v15  ;;  %v2326_v62 = vpop.f32.mrb[4].mxu0 }
  0xe2   :  { %v2328_v63 = vpop.f32.mrb[5].mxu0 }
  0xe3   :  { %2045 = vpow2.f32 %v1746_v21  ;;  %v2330_v1 = vpop.f32.mrb[6].mxu0 }
  0xe4   :  { %v2332_v2 = vpop.f32.mrb[7].mxu0 }
  0xeb   :  { %v2044_v19 = vpop.eup %2043 }
  0xec   :  { %256 = vrot.lane.b32.xlu0 %v2044_v19, %s2177_s24 }
  0xed   :  { %v2046_v22 = vpop.eup %2045 }
  0xee   :  { %v246_v23 = vadd.f32 1.0, %v2046_v22  ;;  %v2029_v22 = vld [vmem:[%s2633_s2] sm:$0xff]  }
  0xf0   :  { %251 = vrot.lane.b32.xlu0 %v179_v20, %s2178_s3  ;;  %2047 = vrcp.f32 %v246_v23  ;;  %v2030_v23 = vld [vmem:[%s2633_s2 + $0x8] sm:$0xff]  }
  0xfa   :  { %v2048_v24 = vpop.eup %2047 }
 0x15e   :  { %v257_v25 = vpop.permute.xlu0 %256 }
 0x15f   :  { %v259_v26 = vmul.f32 %v2048_v24, %v257_v25 }
 0x161   :  { %261 = vrot.lane.b32.xlu1 %v259_v26, %s2178_s3 }
 0x162   :  { %v252_v27 = vpop.permute.xlu0 %251 }
 0x163   :  { %v254_v28 = vmul.f32 %v2048_v24, %v252_v27 }
 0x1d3   :  { %v262_v29 = vpop.permute.xlu1 %261 }
 0x1d4   :  { %v264_v30 = vadd.f32 %v262_v29, %v254_v28  ;;  %v151_v29 = vadd.f32 %v2277_v12, %v2272_v8 }
 0x1d6   :  { %2049 = vtanh.f32 %v264_v30 }
 0x1e0   :  { %v2050_v33 = vpop.eup %2049 }
 0x1e1   :  { %267 = vrot.lane.b32.xlu1 %v2050_v33, %s2177_s24 }
 0x253   :  { %v268_v34 = vpop.permute.xlu1 %267 }
 0x254   :  { %v2291_v35 = vmul.f32 %v2048_v24, %v268_v34 }
 0x256   :  { %v278_v36 = vpack.c.bf16 %v2291_v35, %v2291_v35 }
 0x258   :  { %284 = vrot.lane.b32.xlu0 %v278_v36, %s2178_s3 }
 0x2ca   :  { %v285_v37 = vpop.permute.xlu0 %284 }
 0x2cb   :  { %1886 = vmatmul.mubr.msk.bf16.vlgmr.msra.gmra.mrb[4].mxu1 %vm44_vm0, %v285_v37 }
 0x2cc   :  { %1901 = vmatprep.mubr.msk.bf16.mxu1 %vm2176_vm1, %v2175_v0  ;;  %1898 = vmatpush3.bf16.msra.mxu1 %v2029_v22 }
 0x2cd   :  { %1899 = vmatprep.subr.bf16.mxu1 %v2175_v0 }
 0x2d0   :  { %1900 = vmatpush3.bf16.msra.mxu1 %v2030_v23 }
 0x2d1   :  { %1913 = vmatprep.subr.bf16.mxu1 %v2175_v0 }
 0x39e   :  { %v335_v39 = vpop.f32.mrb[4].mxu1 }
 0x39f   :  { %v341_v40 = vadd.f32 %v335_v39, %v143_v38  ;;  %v1887_v41 = vpop.f32.mrb[5].mxu1 }
 0x3a0   :  { %v338_v42 = vpop.f32.mrb[6].mxu1 }
 0x3a1   :  { %2051 = vtanh.f32 %v341_v40  ;;  %v1888_v43 = vpop.f32.mrb[7].mxu1  ;;  %v1750_v45 = vmul.f32 -1.442695, %v341_v40 }
 0x3a3   :  { %2053 = vpow2.f32 %v1750_v45  ;;  %v2031_v45 = vld [vmem:[%s2633_s2] sm:$0xff]  }
 0x3ab   :  { %v2052_v44 = vpop.eup %2051 }
 0x3ac   :  { %351 = vrot.lane.b32.xlu1 %v2052_v44, %s2177_s24 }
 0x3ad   :  { %v2054_v46 = vpop.eup %2053 }
 0x3ae   :  { %v345_v47 = vadd.f32 1.0, %v2054_v46  ;;  %v2032_v46 = vld [vmem:[%s2633_s2 + $0x8] sm:$0xff]  }
 0x3b0   :  { %2055 = vrcp.f32 %v345_v47 }
 0x3ba   :  { %v2056_v48 = vpop.eup %2055 }
 0x3bb   :  { %v349_v51 = vmul.f32 %v2056_v48, %v264_v30 }
 0x41e   :  { %v352_v49 = vpop.permute.xlu1 %351 }
 0x41f   :  { %v354_v50 = vmul.f32 %v2056_v48, %v352_v49 }
 0x421   :  { %356 = vrot.lane.b32.xlu0 %v354_v50, %s2178_s3 }
 0x493   :  { %v357_v52 = vpop.permute.xlu0 %356 }
 0x494   :  { %v359_v53 = vadd.f32 %v357_v52, %v349_v51  ;;  %v156_v52 = vadd.f32 %v2272_v8, %v2328_v63 }
 0x496   :  { %2057 = vtanh.f32 %v359_v53 }
 0x4a0   :  { %v2058_v58 = vpop.eup %2057 }
 0x4a1   :  { %362 = vrot.lane.b32.xlu1 %v2058_v58, %s2177_s24 }
 0x513   :  { %v363_v59 = vpop.permute.xlu1 %362 }
 0x514   :  { %v2321_v60 = vmul.f32 %v2056_v48, %v363_v59 }
 0x516   :  { %v374_v61 = vpack.c.bf16 %v2321_v60, %v2321_v60 }
 0x518   :  { %380 = vrot.lane.b32.xlu0 %v374_v61, %s2178_s3 }
 0x58a   :  { %v381_v3 = vpop.permute.xlu0 %380 }
 0x58b   :  { %1894 = vmatmul.mubr.msk.bf16.vlgmr.msra.gmra.mrb[8].mxu0 %vm44_vm0, %v381_v3 }
 0x58c   :  { %1909 = vmatprep.mubr.msk.bf16.mxu0 %vm2176_vm1, %v2175_v0  ;;  %1906 = vmatpush3.bf16.msra.mxu0 %v2031_v45 }
 0x58d   :  { %1907 = vmatprep.subr.bf16.mxu0 %v2175_v0 }
 0x590   :  { %1908 = vmatpush3.bf16.msra.mxu0 %v2032_v46 }
 0x591   :  { %1921 = vmatprep.subr.bf16.mxu0 %v2175_v0 }
 0x65e   :  { %v431_v5 = vpop.f32.mrb[8].mxu0 }
 0x65f   :  { %v437_v6 = vadd.f32 %v431_v5, %v148_v4  ;;  %v1895_v7 = vpop.f32.mrb[9].mxu0 }
 0x660   :  { %v434_v10 = vpop.f32.mrb[10].mxu0 }
 0x661   :  { %2059 = vtanh.f32 %v437_v6  ;;  %v1896_v11 = vpop.f32.mrb[11].mxu0  ;;  %v1754_v14 = vmul.f32 -1.442695, %v437_v6 }
 0x662   :  { %v2033_v11 = vld [vmem:[%s2633_s2] sm:$0xff]  }
 0x663   :  { %2061 = vpow2.f32 %v1754_v14 }
 0x66b   :  { %v2060_v13 = vpop.eup %2059 }
 0x66c   :  { %447 = vrot.lane.b32.xlu1 %v2060_v13, %s2177_s24  ;;  %v2034_v13 = vld [vmem:[%s2633_s2 + $0x8] sm:$0xff]  }
 0x66d   :  { %v2062_v15 = vpop.eup %2061 }
 0x66e   :  { %v441_v16 = vadd.f32 1.0, %v2062_v15 }
 0x670   :  { %2063 = vrcp.f32 %v441_v16 }
 0x67a   :  { %v2064_v17 = vpop.eup %2063 }
 0x67b   :  { %v445_v9 = vmul.f32 %v2064_v17, %v359_v53 }
 0x6de   :  { %v448_v18 = vpop.permute.xlu1 %447 }
 0x6df   :  { %v450_v19 = vmul.f32 %v2064_v17, %v448_v18 }
 0x6e1   :  { %452 = vrot.lane.b32.xlu0 %v450_v19, %s2178_s3  ;;  %v159_v19 = vadd.f32 %v2272_v8, %v2332_v2 }
 0x753   :  { %v453_v20 = vpop.permute.xlu0 %452 }
 0x754   :  { %v455_v21 = vadd.f32 %v453_v20, %v445_v9 }
 0x756   :  { %2065 = vtanh.f32 %v455_v21 }
 0x760   :  { %v2066_v24 = vpop.eup %2065 }
 0x761   :  { %458 = vrot.lane.b32.xlu1 %v2066_v24, %s2177_s24 }
 0x7d3   :  { %v459_v25 = vpop.permute.xlu1 %458 }
 0x7d4   :  { %v2350_v26 = vmul.f32 %v2064_v17, %v459_v25 }
 0x7d6   :  { %v470_v27 = vpack.c.bf16 %v2350_v26, %v2350_v26 }
 0x7d8   :  { %476 = vrot.lane.b32.xlu0 %v470_v27, %s2178_s3 }
 0x84a   :  { %v477_v28 = vpop.permute.xlu0 %476 }
 0x84b   :  { %1902 = vmatmul.mubr.msk.bf16.vlgmr.msra.gmra.mrb[8].mxu1 %vm44_vm0, %v477_v28 }
 0x84c   :  { %1917 = vmatprep.mubr.msk.bf16.mxu1 %vm2176_vm1, %v2175_v0  ;;  %1914 = vmatpush3.bf16.msra.mxu1 %v2033_v11 }
 0x84d   :  { %1915 = vmatprep.subr.bf16.mxu1 %v2175_v0 }
 0x850   :  { %1916 = vmatpush3.bf16.msra.mxu1 %v2034_v13 }
 0x851   :  { %1929 = vmatprep.subr.bf16.mxu1 %v2175_v0 }
 0x91e   :  { %v527_v30 = vpop.f32.mrb[8].mxu1 }
 0x91f   :  { %v533_v31 = vadd.f32 %v527_v30, %v151_v29  ;;  %v1903_v32 = vpop.f32.mrb[9].mxu1 }
 0x920   :  { %v530_v33 = vpop.f32.mrb[10].mxu1 }
 0x921   :  { %2067 = vtanh.f32 %v533_v31  ;;  %v1904_v34 = vpop.f32.mrb[11].mxu1  ;;  %v1758_v37 = vmul.f32 -1.442695, %v533_v31 }
 0x922   :  { %v2035_v34 = vld [vmem:[%s2633_s2] sm:$0xff]  }
 0x923   :  { %2069 = vpow2.f32 %v1758_v37 }
 0x92b   :  { %v2068_v36 = vpop.eup %2067 }
 0x92c   :  { %543 = vrot.lane.b32.xlu1 %v2068_v36, %s2177_s24  ;;  %v2036_v36 = vld [vmem:[%s2633_s2 + $0x8] sm:$0xff]  }
 0x92d   :  { %v2070_v38 = vpop.eup %2069 }
 0x92e   :  { %v537_v39 = vadd.f32 1.0, %v2070_v38 }
 0x930   :  { %2071 = vrcp.f32 %v537_v39 }
 0x93a   :  { %v2072_v40 = vpop.eup %2071 }
 0x93b   :  { %v541_v12 = vmul.f32 %v2072_v40, %v455_v21 }
 0x99e   :  { %v544_v41 = vpop.permute.xlu1 %543 }
 0x99f   :  { %v546_v42 = vmul.f32 %v2072_v40, %v544_v41 }
 0x9a1   :  { %548 = vrot.lane.b32.xlu0 %v546_v42, %s2178_s3  ;;  %v164_v42 = vadd.f32 %v2326_v62, %v2272_v8 }
 0xa13   :  { %v549_v43 = vpop.permute.xlu0 %548 }
 0xa14   :  { %v551_v44 = vadd.f32 %v549_v43, %v541_v12 }
 0xa16   :  { %2073 = vtanh.f32 %v551_v44 }
 0xa20   :  { %v2074_v47 = vpop.eup %2073 }
 0xa21   :  { %554 = vrot.lane.b32.xlu1 %v2074_v47, %s2177_s24 }
 0xa93   :  { %v555_v48 = vpop.permute.xlu1 %554 }
 0xa94   :  { %v2371_v49 = vmul.f32 %v2072_v40, %v555_v48 }
 0xa96   :  { %v566_v50 = vpack.c.bf16 %v2371_v49, %v2371_v49 }
 0xa98   :  { %572 = vrot.lane.b32.xlu0 %v566_v50, %s2178_s3 }
 0xb0a   :  { %v573_v51 = vpop.permute.xlu0 %572 }
 0xb0b   :  { %1910 = vmatmul.mubr.msk.bf16.vlgmr.msra.gmra.mrb[12].mxu0 %vm44_vm0, %v573_v51 }
 0xb0c   :  { %1925 = vmatprep.mubr.msk.bf16.mxu0 %vm2176_vm1, %v2175_v0  ;;  %1922 = vmatpush3.bf16.msra.mxu0 %v2035_v34 }
 0xb0d   :  { %1923 = vmatprep.subr.bf16.mxu0 %v2175_v0 }
 0xb10   :  { %1924 = vmatpush3.bf16.msra.mxu0 %v2036_v36 }
 0xbde   :  { %v623_v53 = vpop.f32.mrb[12].mxu0 }
 0xbdf   :  { %v629_v54 = vadd.f32 %v623_v53, %v156_v52  ;;  %v1911_v55 = vpop.f32.mrb[13].mxu0 }
 0xbe0   :  { %v626_v56 = vpop.f32.mrb[14].mxu0 }
 0xbe1   :  { %2075 = vtanh.f32 %v629_v54  ;;  %v1912_v57 = vpop.f32.mrb[15].mxu0  ;;  %v1762_v59 = vmul.f32 -1.442695, %v629_v54 }
 0xbe3   :  { %2077 = vpow2.f32 %v1762_v59  ;;  %v2037_v59 = vld [vmem:[%s2636_s4] sm:$0xff]  }
 0xbe4   :  { %1937 = vmatprep.subr.bf16.mxu0 %v2037_v59 }
 0xbeb   :  { %v2076_v58 = vpop.eup %2075 }
 0xbec   :  { %639 = vrot.lane.b32.xlu1 %v2076_v58, %s2177_s24 }
 0xbed   :  { %v2078_v61 = vpop.eup %2077 }
 0xbee   :  { %v633_v3 = vadd.f32 1.0, %v2078_v61  ;;  %v2039_v61 = vld [vmem:[%s2633_s2] sm:$0xff]  }
 0xbf0   :  { %2079 = vrcp.f32 %v633_v3  ;;  %v2040_v3 = vld [vmem:[%s2633_s2 + $0x8] sm:$0xff]  }
 0xbfa   :  { %v2080_v4 = vpop.eup %2079 }
 0xbfb   :  { %v637_v63 = vmul.f32 %v2080_v4, %v551_v44 }
 0xc5e   :  { %v640_v5 = vpop.permute.xlu1 %639 }
 0xc5f   :  { %v642_v6 = vmul.f32 %v2080_v4, %v640_v5 }
 0xc61   :  { %644 = vrot.lane.b32.xlu0 %v642_v6, %s2178_s3 }
 0xcd3   :  { %v645_v7 = vpop.permute.xlu0 %644 }
 0xcd4   :  { %v647_v10 = vadd.f32 %v645_v7, %v637_v63 }
 0xcd6   :  { %2081 = vtanh.f32 %v647_v10 }
 0xce0   :  { %v2082_v14 = vpop.eup %2081 }
 0xce1   :  { %650 = vrot.lane.b32.xlu1 %v2082_v14, %s2177_s24 }
 0xd53   :  { %v651_v15 = vpop.permute.xlu1 %650 }
 0xd54   :  { %v2392_v16 = vmul.f32 %v2080_v4, %v651_v15  ;;  %v2462_v15 = vld [vmem:[%s2637_s5] sm:$0xff]  }
 0xd56   :  { %v662_v17 = vpack.c.bf16 %v2392_v16, %v2392_v16 }
 0xd58   :  { %668 = vrot.lane.b32.xlu0 %v662_v17, %s2178_s3  ;;  %v2470_v17 = vld [vmem:[%s2637_s5 + $0x8] sm:$0xff]  }
 0xdca   :  { %v669_v18 = vpop.permute.xlu0 %668 }
 0xdcb   :  { %1918 = vmatmul.mubr.msk.bf16.vlgmr.msra.gmra.mrb[12].mxu1 %vm44_vm0, %v669_v18  ;;  %v1077_v18 = vld [vmem:[#allocation5 + $0x8] sm:$0xff] }
 0xdcc   :  { %1933 = vmatprep.mubr.msk.bf16.mxu1 %vm2176_vm1, %v2175_v0  ;;  %1930 = vmatpush3.bf16.msra.mxu1 %v2039_v61 }
 0xdcd   :  { %1931 = vmatprep.subr.bf16.mxu1 %v2175_v0 }
 0xdd0   :  { %1932 = vmatpush3.bf16.msra.mxu1 %v2040_v3 }
 0xdd1   :  { %1949 = vmatprep.subr.bf16.mxu1 %v2175_v0 }
 0xe9e   :  { %v719_v9 = vpop.f32.mrb[12].mxu1 }
 0xe9f   :  { %v725_v20 = vadd.f32 %v719_v9, %v159_v19  ;;  %v1919_v21 = vpop.f32.mrb[13].mxu1  ;;  %v1075_v9 = vld [vmem:[#allocation4 + $0x8] sm:$0xff] }
 0xea0   :  { %v722_v22 = vpop.f32.mrb[14].mxu1 }
 0xea1   :  { %2083 = vtanh.f32 %v725_v20  ;;  %v1920_v23 = vpop.f32.mrb[15].mxu1  ;;  %v1766_v25 = vmul.f32 -1.442695, %v725_v20  ;;  %v1079_v20 = vpack.c.bf16 %v1075_v9, %v1075_v9 }
 0xea3   :  { %2085 = vpow2.f32 %v1766_v25  ;;  %v167_v25 = vadd.f32 %v2330_v1, %v2272_v8 }
 0xeab   :  { %v2084_v24 = vpop.eup %2083 }
 0xeac   :  { %735 = vrot.lane.b32.xlu1 %v2084_v24, %s2177_s24 }
 0xead   :  { %v2086_v27 = vpop.eup %2085 }
 0xeae   :  { %v729_v28 = vadd.f32 1.0, %v2086_v27 }
 0xeb0   :  { %2087 = vrcp.f32 %v729_v28 }
 0xeba   :  { %v2088_v29 = vpop.eup %2087 }
 0xebb   :  { %v733_v2 = vmul.f32 %v2088_v29, %v647_v10 }
 0xf1e   :  { %v736_v30 = vpop.permute.xlu1 %735 }
 0xf1f   :  { %v738_v31 = vmul.f32 %v2088_v29, %v736_v30 }
 0xf21   :  { %740 = vrot.lane.b32.xlu0 %v738_v31, %s2178_s3 }
 0xf93   :  { %v741_v32 = vpop.permute.xlu0 %740 }
 0xf94   :  { %v743_v33 = vadd.f32 %v741_v32, %v733_v2  ;;  %v2500_v2 = vld [vmem:[%s2638_s6] ss:$0 sm:$0xff] }
 0xf96   :  { %2089 = vtanh.f32 %v743_v33 }
 0xfa0   :  { %v2090_v37 = vpop.eup %2089 }
 0xfa1   :  { %746 = vrot.lane.b32.xlu1 %v2090_v37, %s2177_s24 }
0x1013   :  { %v747_v38 = vpop.permute.xlu1 %746 }
0x1014   :  { %v2412_v39 = vmul.f32 %v2088_v29, %v747_v38 }
0x1016   :  { %v758_v40 = vpack.c.bf16 %v2412_v39, %v2412_v39 }
0x1018   :  { %764 = vrot.lane.b32.xlu0 %v758_v40, %s2178_s3 }
0x108a   :  { %v765_v41 = vpop.permute.xlu0 %764 }
0x108b   :  { %1926 = vmatmul.mubr.msk.bf16.vlgmr.msra.gmra.mrb[16].mxu0 %vm44_vm0, %v765_v41 }
0x108c   :  { %1938 = vmatpush3.bf16.msra.mxu0 %v2037_v59 }
0x115e   :  { %v815_v12 = vpop.f32.mrb[16].mxu0 }
0x115f   :  { %v821_v43 = vadd.f32 %v815_v12, %v164_v42  ;;  %v1927_v44 = vpop.f32.mrb[17].mxu0 }
0x1160   :  { %v818_v45 = vpop.f32.mrb[18].mxu0 }
0x1161   :  { %2091 = vtanh.f32 %v821_v43  ;;  %v1928_v46 = vpop.f32.mrb[19].mxu0  ;;  %v1770_v48 = vmul.f32 -1.442695, %v821_v43 }
0x1163   :  { %2093 = vpow2.f32 %v1770_v48 }
0x116b   :  { %v2092_v47 = vpop.eup %2091 }
0x116c   :  { %831 = vrot.lane.b32.xlu1 %v2092_v47, %s2177_s24 }
0x116d   :  { %v2094_v50 = vpop.eup %2093 }
0x116e   :  { %v825_v51 = vadd.f32 1.0, %v2094_v50 }
0x1170   :  { %2095 = vrcp.f32 %v825_v51 }
0x117a   :  { %v2096_v52 = vpop.eup %2095 }
0x117b   :  { %v829_v62 = vmul.f32 %v2096_v52, %v743_v33 }
0x11de   :  { %v832_v53 = vpop.permute.xlu1 %831 }
0x11df   :  { %v834_v54 = vmul.f32 %v2096_v52, %v832_v53 }
0x11e1   :  { %836 = vrot.lane.b32.xlu0 %v834_v54, %s2178_s3 }
0x11e5   :  { %272 = vrot.lane.b32.xlu0 %v2291_v35, %s2178_s3  ;;  %v2038_v35 = vld [vmem:[%s2636_s4 + $0x8] sm:$0xff]  }
0x11e6   :  { %1939 = vmatprep.subr.bf16.mxu0 %v2038_v35 }
0x11e7   :  { %1940 = vmatpush3.bf16.msra.mxu0 %v2038_v35 }
0x11e8   :  { %1965 = vmatprep.subr.bf16.mxu0 %v2175_v0 }
0x11e9   :  { %463 = vrot.lane.b32.xlu0 %v2350_v26, %s2178_s3 }
0x1253   :  { %v837_v55 = vpop.permute.xlu0 %836 }
0x1254   :  { %v2426_v56 = vadd.f32 %v837_v55, %v829_v62 }
0x1256   :  { %2097 = vtanh.f32 %v2426_v56 }
0x1257   :  { %v273_v57 = vpop.permute.xlu0 %272 }
0x1258   :  { %275 = vst.msk [vmem:[#allocation3] sm:$0xff] %vm44_vm0, %v273_v57 }
0x125b   :  { %v464_v58 = vpop.permute.xlu0 %463 }
0x125c   :  { %467 = vst.msk [vmem:[#allocation3 + $0x10] sm:$0xff] %vm44_vm0, %v464_v58 }
0x1260   :  { %v2098_v26 = vpop.eup %2097 }
0x1261   :  { %842 = vrot.lane.b32.xlu1 %v2098_v26, %s2177_s24 }
0x1263   :  { %v956_v11 = vld [vmem:[#allocation3 + $0x10] sm:$0xff] }
0x1265   :  { %367 = vrot.lane.b32.xlu1 %v2321_v60, %s2178_s3 }
0x1269   :  { %559 = vrot.lane.b32.xlu1 %v2371_v49, %s2178_s3  ;;  %v954_v49 = vld [vmem:[#allocation3] sm:$0xff] }
0x12d3   :  { %v843_v4 = vpop.permute.xlu1 %842 }
0x12d4   :  { %v2451_v5 = vmul.f32 %v2096_v52, %v843_v4 }
0x12d6   :  { %v854_v60 = vpack.c.bf16 %v2451_v5, %v2451_v5 }
0x12d7   :  { %v368_v6 = vpop.permute.xlu1 %367 }
0x12d8   :  { %371 = vst.msk [vmem:[#allocation3 + $0x8] sm:$0xff] %vm44_vm0, %v368_v6  ;;  %860 = vrot.lane.b32.xlu0 %v854_v60, %s2178_s3 }
0x12db   :  { %v560_v63 = vpop.permute.xlu1 %559 }
0x12dc   :  { %563 = vst.msk [vmem:[#allocation3 + $0x18] sm:$0xff] %vm44_vm0, %v560_v63  ;;  %1148 = vrot.lane.b32.xlu0 %v1077_v18, %s2178_s3 }
0x12df   :  { %v955_v7 = vld [vmem:[#allocation3 + $0x8] sm:$0xff] }
0x12e0   :  { %v963_v10 = vpack.c.bf16 %v955_v7, %v954_v49 }
0x12e2   :  { %1941 = vmatprep.mubr.msk.bf16.mxu0 %vm44_vm0, %v963_v10 }
0x12e3   :  { %v957_v13 = vld [vmem:[#allocation3 + $0x18] sm:$0xff] }
0x12e4   :  { %v964_v14 = vpack.c.bf16 %v957_v13, %v956_v11 }
0x12e6   :  { %1942 = vmatmul.mubr.msk.bf16.vlgmr.msra.gmra.mrb[20].mxu0 %vm44_vm0, %v964_v14 }
0x12e7   :  { %1966 = vmatpush3.bf16.msra.mxu0 %v2462_v15 }
0x12e8   :  { %1967 = vmatprep.subr.bf16.mxu0 %v2175_v0 }
0x12eb   :  { %1968 = vmatpush3.bf16.msra.mxu0 %v2470_v17 }
0x12ec   :  { %1981 = vmatprep.subr.bf16.mxu0 %v2175_v0 }
0x134a   :  { %v861_v19 = vpop.permute.xlu0 %860 }
0x134b   :  { %1934 = vmatmul.mubr.msk.bf16.vlgmr.msra.gmra.mrb[16].mxu1 %vm44_vm0, %v861_v19 }
0x134c   :  { %1950 = vmatpush3.bf16.msra.mxu1 %v2462_v15  ;;  %1953 = vmatprep.mubr.msk.bf16.mxu1 %vm2176_vm1, %v2175_v0 }
0x134d   :  { %1951 = vmatprep.subr.bf16.mxu1 %v2175_v0 }
0x134e   :  { %v1149_v44 = vpop.permute.xlu0 %1148 }
0x1350   :  { %1952 = vmatpush3.bf16.msra.mxu1 %v2470_v17 }
0x1351   :  { %1957 = vmatprep.subr.bf16.mxu1 %v2175_v0 }
0x1353   :  { %1954 = vmatmul.mubr.msk.bf16.vlgmr.msra.gmra.mrb[20].mxu1 %vm44_vm0, %v1079_v20 }
0x1354   :  { %1958 = vmatpush3.bf16.msra.mxu1 %v2462_v15  ;;  %1961 = vmatprep.mubr.msk.bf16.mxu1 %vm2176_vm1, %v2175_v0 }
0x1355   :  { %1959 = vmatprep.subr.bf16.mxu1 %v2175_v0 }
0x1358   :  { %1960 = vmatpush3.bf16.msra.mxu1 %v2470_v17 }
0x1359   :  { %1973 = vmatprep.subr.bf16.mxu1 %v2175_v0 }
0x13b9   :  { %v2489_v21 = vpop.f32.mrb[20].mxu0 }
0x13ba   :  { %v1035_v22 = vpop.f32.mrb[21].mxu0 }
0x13bb   :  { %v2491_v23 = vpop.f32.mrb[22].mxu0  ;;  %v1036_v32 = vadd.f32 %v2500_v2, %v1035_v22 }
0x13bc   :  { %v2493_v24 = vpop.f32.mrb[23].mxu0 }
0x13bd   :  { %v1039_v63 = vadd.f32 %v2500_v2, %v2493_v24 }
0x141e   :  { %v911_v27 = vpop.f32.mrb[16].mxu1 }
0x141f   :  { %v917_v28 = vadd.f32 %v911_v27, %v167_v25  ;;  %v1935_v29 = vpop.f32.mrb[17].mxu1 }
0x1420   :  { %v914_v30 = vpop.f32.mrb[18].mxu1 }
0x1421   :  { %v1936_v31 = vpop.f32.mrb[19].mxu1  ;;  %v1774_v51 = vmul.f32 -1.442695, %v917_v28 }
0x1426   :  { %v1133_v33 = vpop.f32.mrb[20].mxu1 }
0x1427   :  { %v1139_v34 = vadd.f32 %v1133_v33, %v1036_v32  ;;  %v1955_v36 = vpop.f32.mrb[21].mxu1 }
0x1428   :  { %v1136_v37 = vpop.f32.mrb[22].mxu1 }
0x1429   :  { %2099 = vtanh.f32 %v1139_v34  ;;  %v1956_v38 = vpop.f32.mrb[23].mxu1  ;;  %v1785_v8 = vmul.f32 -1.442695, %v1139_v34 }
0x142b   :  { %2101 = vpow2.f32 %v1785_v8 }
0x1433   :  { %v2100_v40 = vpop.eup %2099 }
0x1434   :  { %1153 = vrot.lane.b32.xlu1 %v2100_v40, %s2177_s24 }
0x1435   :  { %v2102_v1 = vpop.eup %2101 }
0x1436   :  { %v1143_v41 = vadd.f32 1.0, %v2102_v1 }
0x1438   :  { %2103 = vrcp.f32 %v1143_v41 }
0x1442   :  { %v2104_v42 = vpop.eup %2103 }
0x1443   :  { %v1151_v45 = vmul.f32 %v2104_v42, %v1149_v44 }
0x14a6   :  { %v1154_v12 = vpop.permute.xlu1 %1153 }
0x14a7   :  { %v1156_v43 = vmul.f32 %v2104_v42, %v1154_v12 }
0x14a9   :  { %1158 = vrot.lane.b32.xlu1 %v1156_v43, %s2178_s3  ;;  %v1044_v43 = vadd.f32 %v2489_v21, %v2500_v2 }
0x151b   :  { %v1159_v46 = vpop.permute.xlu1 %1158 }
0x151c   :  { %v1161_v47 = vadd.f32 %v1159_v46, %v1151_v45 }
0x151e   :  { %2105 = vtanh.f32 %v1161_v47 }
0x151f   :  { %2107 = vtanh.f32 %v917_v28 }
0x1520   :  { %2109 = vpow2.f32 %v1774_v51 }
0x1528   :  { %v2106_v48 = vpop.eup %2105 }
0x1529   :  { %1164 = vrot.lane.b32.xlu0 %v2106_v48, %s2177_s24  ;;  %v2108_v50 = vpop.eup %2107 }
0x152a   :  { %v2110_v52 = vpop.eup %2109 }
0x152b   :  { %v921_v53 = vadd.f32 1.0, %v2110_v52 }
0x152d   :  { %927 = vrot.lane.b32.xlu0 %v2108_v50, %s2177_s24  ;;  %2111 = vrcp.f32 %v921_v53 }
0x1537   :  { %v2112_v57 = vpop.eup %2111 }
0x1538   :  { %v925_v26 = vmul.f32 %v2112_v57, %v2426_v56 }
0x159b   :  { %v1165_v54 = vpop.permute.xlu0 %1164 }
0x159c   :  { %v1167_v62 = vmul.f32 %v2104_v42, %v1165_v54 }
0x159e   :  { %v1169_v55 = vpack.c.bf16 %v1167_v62, %v1167_v62 }
0x159f   :  { %v928_v58 = vpop.permute.xlu0 %927 }
0x15a0   :  { %v930_v59 = vmul.f32 %v2112_v57, %v928_v58  ;;  %1171 = vrot.lane.b32.xlu1 %v1169_v55, %s2178_s3 }
0x15a2   :  { %932 = vrot.lane.b32.xlu0 %v930_v59, %s2178_s3 }
0x1612   :  { %v1172_v35 = vpop.permute.xlu1 %1171 }
0x1613   :  { %1962 = vmatmul.mubr.msk.bf16.vlgmr.msra.gmra.mrb[24].mxu1 %vm44_vm0, %v1172_v35 }
0x1614   :  { %v933_v61 = vpop.permute.xlu0 %932  ;;  %1974 = vmatpush3.bf16.msra.mxu1 %v2462_v15  ;;  %1977 = vmatprep.mubr.msk.bf16.mxu1 %vm2176_vm1, %v2175_v0 }
0x1615   :  { %v2514_v3 = vadd.f32 %v933_v61, %v925_v26  ;;  %1975 = vmatprep.subr.bf16.mxu1 %v2175_v0 }
0x1617   :  { %2113 = vtanh.f32 %v2514_v3 }
0x1618   :  { %1976 = vmatpush3.bf16.msra.mxu1 %v2470_v17 }
0x1619   :  { %1989 = vmatprep.subr.bf16.mxu1 %v2175_v0 }
0x1621   :  { %v2114_v4 = vpop.eup %2113 }
0x1622   :  { %938 = vrot.lane.b32.xlu0 %v2114_v4, %s2177_s24 }
0x1626   :  { %655 = vrot.lane.b32.xlu0 %v2392_v16, %s2178_s3 }
0x162a   :  { %847 = vrot.lane.b32.xlu0 %v2451_v5, %s2178_s3 }
0x1694   :  { %v939_v56 = vpop.permute.xlu0 %938 }
0x1695   :  { %v941_v28 = vmul.f32 %v2112_v57, %v939_v56  ;;  %v1047_v56 = vadd.f32 %v2491_v23, %v2500_v2 }
0x1698   :  { %v656_v60 = vpop.permute.xlu0 %655 }
0x1699   :  { %659 = vst.msk [vmem:[#allocation3 + $0x20] sm:$0xff] %vm44_vm0, %v656_v60 }
0x169c   :  { %v848_v6 = vpop.permute.xlu0 %847 }
0x169d   :  { %851 = vst.msk [vmem:[#allocation3 + $0x30] sm:$0xff] %vm44_vm0, %v848_v6 }
0x16a0   :  { %v958_v34 = vld [vmem:[#allocation3 + $0x20] sm:$0xff] }
0x16e6   :  { %v1210_v49 = vpop.f32.mrb[24].mxu1 }
0x16e7   :  { %v1216_v7 = vadd.f32 %v1210_v49, %v1039_v63  ;;  %v1963_v10 = vpop.f32.mrb[25].mxu1 }
0x16e8   :  { %v1213_v11 = vpop.f32.mrb[26].mxu1 }
0x16e9   :  { %2115 = vtanh.f32 %v1216_v7  ;;  %v1964_v13 = vpop.f32.mrb[27].mxu1  ;;  %v1787_v5 = vmul.f32 -1.442695, %v1216_v7 }
0x16eb   :  { %2117 = vpow2.f32 %v1787_v5 }
0x16f3   :  { %v2116_v16 = vpop.eup %2115 }
0x16f4   :  { %1226 = vrot.lane.b32.xlu1 %v2116_v16, %s2177_s24 }
0x16f5   :  { %v2118_v14 = vpop.eup %2117 }
0x16f6   :  { %v1220_v18 = vadd.f32 1.0, %v2118_v14 }
0x16f8   :  { %2119 = vrcp.f32 %v1220_v18 }
0x1702   :  { %v2120_v19 = vpop.eup %2119 }
0x1703   :  { %v1224_v22 = vmul.f32 %v2120_v19, %v1161_v47 }
0x1766   :  { %v1227_v9 = vpop.permute.xlu1 %1226 }
0x1767   :  { %v1229_v20 = vmul.f32 %v2120_v19, %v1227_v9 }
0x1769   :  { %1231 = vrot.lane.b32.xlu1 %v1229_v20, %s2178_s3 }
0x17db   :  { %v1232_v24 = vpop.permute.xlu1 %1231 }
0x17dc   :  { %v1234_v25 = vadd.f32 %v1232_v24, %v1224_v22 }
0x17de   :  { %2121 = vtanh.f32 %v1234_v25 }
0x17e8   :  { %v2122_v27 = vpop.eup %2121 }
0x17e9   :  { %1237 = vrot.lane.b32.xlu1 %v2122_v27, %s2177_s24 }
0x17ed   :  { %751 = vrot.lane.b32.xlu1 %v2412_v39, %s2178_s3  ;;  %v960_v39 = vld [vmem:[#allocation3 + $0x30] sm:$0xff] }
0x17f1   :  { %943 = vrot.lane.b32.xlu1 %v941_v28, %s2178_s3 }
0x185b   :  { %v1238_v29 = vpop.permute.xlu1 %1237 }
0x185c   :  { %v1240_v30 = vmul.f32 %v2120_v19, %v1238_v29 }
0x185e   :  { %v1242_v31 = vpack.c.bf16 %v1240_v30, %v1240_v30 }
0x185f   :  { %v752_v32 = vpop.permute.xlu1 %751 }
0x1860   :  { %755 = vst.msk [vmem:[#allocation3 + $0x28] sm:$0xff] %vm44_vm0, %v752_v32  ;;  %1244 = vrot.lane.b32.xlu0 %v1242_v31, %s2178_s3 }
0x1863   :  { %v944_v33 = vpop.permute.xlu1 %943 }
0x1864   :  { %947 = vst.msk [vmem:[#allocation3 + $0x38] sm:$0xff] %vm44_vm0, %v944_v33  ;;  %948 = vst.msk [vmem:[#allocation4] sm:$0xff] %vm44_vm0, %v944_v33 }
0x1867   :  { %v959_v36 = vld [vmem:[#allocation3 + $0x28] sm:$0xff] }
0x1868   :  { %v965_v37 = vpack.c.bf16 %v959_v36, %v958_v34 }
0x186a   :  { %1945 = vmatprep.mubr.msk.bf16.mxu0 %vm44_vm0, %v965_v37 }
0x186b   :  { %v961_v38 = vld [vmem:[#allocation3 + $0x38] sm:$0xff] }
0x186c   :  { %v966_v40 = vpack.c.bf16 %v961_v38, %v960_v39 }
0x186e   :  { %1946 = vmatmul.mubr.msk.bf16.gmra.mrb[24].mxu0 %vm44_vm0, %v966_v40 }
0x186f   :  { %1969 = vmatprep.mubr.msk.bf16.mxu0 %vm2176_vm1, %v2175_v0 }
0x18d2   :  { %v1245_v8 = vpop.permute.xlu0 %1244 }
0x18d3   :  { %1970 = vmatmul.mubr.msk.bf16.vlgmr.msra.gmra.mrb[28].mxu0 %vm44_vm0, %v1245_v8 }
0x18d4   :  { %1982 = vmatpush3.bf16.msra.mxu0 %v2462_v15  ;;  %1985 = vmatprep.mubr.msk.bf16.mxu0 %vm2176_vm1, %v2175_v0 }
0x18d5   :  { %1983 = vmatprep.subr.bf16.mxu0 %v2175_v0 }
0x18d8   :  { %1984 = vmatpush3.bf16.msra.mxu0 %v2470_v17 }
0x18d9   :  { %1997 = vmatprep.subr.bf16.mxu0 %v2175_v0 }
0x1941   :  { %v2550_v1 = vpop.f32.mrb[24].mxu0 }
0x1942   :  { %v2552_v41 = vpop.f32.mrb[25].mxu0 }
0x1943   :  { %v2554_v42 = vpop.f32.mrb[26].mxu0  ;;  %v1052_v28 = vadd.f32 %v2500_v2, %v2552_v41 }
0x1944   :  { %v2556_v12 = vpop.f32.mrb[27].mxu0 }
0x19a6   :  { %v1283_v44 = vpop.f32.mrb[28].mxu0 }
0x19a7   :  { %v1289_v45 = vadd.f32 %v1283_v44, %v1044_v43  ;;  %v1971_v46 = vpop.f32.mrb[29].mxu0 }
0x19a8   :  { %v1286_v47 = vpop.f32.mrb[30].mxu0 }
0x19a9   :  { %2123 = vtanh.f32 %v1289_v45  ;;  %v1972_v48 = vpop.f32.mrb[31].mxu0  ;;  %v1789_v51 = vmul.f32 -1.442695, %v1289_v45 }
0x19ab   :  { %2125 = vpow2.f32 %v1789_v51  ;;  %v1055_v51 = vadd.f32 %v2500_v2, %v2556_v12 }
0x19b3   :  { %v2124_v50 = vpop.eup %2123 }
0x19b4   :  { %1299 = vrot.lane.b32.xlu1 %v2124_v50, %s2177_s24 }
0x19b5   :  { %v2126_v52 = vpop.eup %2125 }
0x19b6   :  { %v1293_v53 = vadd.f32 1.0, %v2126_v52 }
0x19b8   :  { %2127 = vrcp.f32 %v1293_v53 }
0x19c2   :  { %v2128_v54 = vpop.eup %2127 }
0x19c3   :  { %v1297_v21 = vmul.f32 %v2128_v54, %v1234_v25 }
0x1a26   :  { %v1300_v62 = vpop.permute.xlu1 %1299 }
0x1a27   :  { %v1302_v55 = vmul.f32 %v2128_v54, %v1300_v62 }
0x1a29   :  { %1304 = vrot.lane.b32.xlu0 %v1302_v55, %s2178_s3 }
0x1a9b   :  { %v1305_v57 = vpop.permute.xlu0 %1304 }
0x1a9c   :  { %v1307_v58 = vadd.f32 %v1305_v57, %v1297_v21 }
0x1a9e   :  { %2129 = vtanh.f32 %v1307_v58 }
0x1aa8   :  { %v2130_v59 = vpop.eup %2129 }
0x1aa9   :  { %1310 = vrot.lane.b32.xlu1 %v2130_v59, %s2177_s24 }
0x1b1b   :  { %v1311_v35 = vpop.permute.xlu1 %1310 }
0x1b1c   :  { %v1313_v26 = vmul.f32 %v2128_v54, %v1311_v35 }
0x1b1e   :  { %v1315_v61 = vpack.c.bf16 %v1313_v26, %v1313_v26 }
0x1b20   :  { %1317 = vrot.lane.b32.xlu0 %v1315_v61, %s2178_s3 }
0x1b92   :  { %v1318_v4 = vpop.permute.xlu0 %1317 }
0x1b93   :  { %1978 = vmatmul.mubr.msk.bf16.vlgmr.msra.gmra.mrb[28].mxu1 %vm44_vm0, %v1318_v4 }
0x1b94   :  { %1990 = vmatpush3.bf16.msra.mxu1 %v2462_v15  ;;  %1993 = vmatprep.mubr.msk.bf16.mxu1 %vm2176_vm1, %v2175_v0 }
0x1b95   :  { %1991 = vmatprep.subr.bf16.mxu1 %v2175_v0 }
0x1b98   :  { %1992 = vmatpush3.bf16.msra.mxu1 %v2470_v17 }
0x1b99   :  { %2005 = vmatprep.subr.bf16.mxu1 %v2175_v0 }
0x1c66   :  { %v1356_v60 = vpop.f32.mrb[28].mxu1 }
0x1c67   :  { %v1362_v6 = vadd.f32 %v1356_v60, %v1047_v56  ;;  %v1979_v63 = vpop.f32.mrb[29].mxu1 }
0x1c68   :  { %v1359_v49 = vpop.f32.mrb[30].mxu1  ;;  %v1060_v63 = vadd.f32 %v2550_v1, %v2500_v2 }
0x1c69   :  { %2131 = vtanh.f32 %v1362_v6  ;;  %v1980_v7 = vpop.f32.mrb[31].mxu1  ;;  %v1791_v11 = vmul.f32 -1.442695, %v1362_v6 }
0x1c6b   :  { %2133 = vpow2.f32 %v1791_v11 }
0x1c73   :  { %v2132_v10 = vpop.eup %2131 }
0x1c74   :  { %1372 = vrot.lane.b32.xlu1 %v2132_v10, %s2177_s24 }
0x1c75   :  { %v2134_v13 = vpop.eup %2133 }
0x1c76   :  { %v1366_v16 = vadd.f32 1.0, %v2134_v13 }
0x1c78   :  { %2135 = vrcp.f32 %v1366_v16 }
0x1c82   :  { %v2136_v5 = vpop.eup %2135 }
0x1c83   :  { %v1370_v23 = vmul.f32 %v2136_v5, %v1307_v58 }
0x1ce6   :  { %v1373_v14 = vpop.permute.xlu1 %1372 }
0x1ce7   :  { %v1375_v18 = vmul.f32 %v2136_v5, %v1373_v14 }
0x1ce9   :  { %1377 = vrot.lane.b32.xlu0 %v1375_v18, %s2178_s3 }
0x1d5b   :  { %v1378_v19 = vpop.permute.xlu0 %1377 }
0x1d5c   :  { %v1380_v9 = vadd.f32 %v1378_v19, %v1370_v23 }
0x1d5e   :  { %2137 = vtanh.f32 %v1380_v9 }
0x1d68   :  { %v2138_v20 = vpop.eup %2137 }
0x1d69   :  { %1383 = vrot.lane.b32.xlu1 %v2138_v20, %s2177_s24 }
0x1ddb   :  { %v1384_v22 = vpop.permute.xlu1 %1383 }
0x1ddc   :  { %v1386_v24 = vmul.f32 %v2136_v5, %v1384_v22 }
0x1dde   :  { %v1388_v25 = vpack.c.bf16 %v1386_v24, %v1386_v24 }
0x1de0   :  { %1390 = vrot.lane.b32.xlu0 %v1388_v25, %s2178_s3 }
0x1e52   :  { %v1391_v27 = vpop.permute.xlu0 %1390 }
0x1e53   :  { %1986 = vmatmul.mubr.msk.bf16.vlgmr.msra.gmra.mrb[32].mxu0 %vm44_vm0, %v1391_v27 }
0x1e54   :  { %1998 = vmatpush3.bf16.msra.mxu0 %v2462_v15  ;;  %2001 = vmatprep.mubr.msk.bf16.mxu0 %vm2176_vm1, %v2175_v0 }
0x1e55   :  { %1999 = vmatprep.subr.bf16.mxu0 %v2175_v0 }
0x1e58   :  { %2000 = vmatpush3.bf16.msra.mxu0 %v2470_v17 }
0x1f26   :  { %v1429_v29 = vpop.f32.mrb[32].mxu0 }
0x1f27   :  { %v1435_v30 = vadd.f32 %v1429_v29, %v1052_v28  ;;  %v1987_v31 = vpop.f32.mrb[33].mxu0 }
0x1f28   :  { %v1432_v32 = vpop.f32.mrb[34].mxu0 }
0x1f29   :  { %2139 = vtanh.f32 %v1435_v30  ;;  %v1988_v33 = vpop.f32.mrb[35].mxu0  ;;  %v1793_v36 = vmul.f32 -1.442695, %v1435_v30  ;;  %v1063_v30 = vadd.f32 %v2554_v42, %v2500_v2 }
0x1f2b   :  { %2141 = vpow2.f32 %v1793_v36 }
0x1f33   :  { %v2140_v34 = vpop.eup %2139 }
0x1f34   :  { %1445 = vrot.lane.b32.xlu1 %v2140_v34, %s2177_s24 }
0x1f35   :  { %v2142_v37 = vpop.eup %2141 }
0x1f36   :  { %v1439_v39 = vadd.f32 1.0, %v2142_v37 }
0x1f38   :  { %2143 = vrcp.f32 %v1439_v39 }
0x1f42   :  { %v2144_v38 = vpop.eup %2143 }
0x1f43   :  { %v1443_v41 = vmul.f32 %v2144_v38, %v1380_v9 }
0x1fa6   :  { %v1446_v40 = vpop.permute.xlu1 %1445 }
0x1fa7   :  { %v1448_v8 = vmul.f32 %v2144_v38, %v1446_v40 }
0x1fa9   :  { %1450 = vrot.lane.b32.xlu0 %v1448_v8, %s2178_s3 }
0x201b   :  { %v1451_v43 = vpop.permute.xlu0 %1450 }
0x201c   :  { %v1453_v44 = vadd.f32 %v1451_v43, %v1443_v41 }
0x201e   :  { %2145 = vtanh.f32 %v1453_v44 }
0x2028   :  { %v2146_v45 = vpop.eup %2145 }
0x2029   :  { %1456 = vrot.lane.b32.xlu1 %v2146_v45, %s2177_s24 }
0x209b   :  { %v1457_v46 = vpop.permute.xlu1 %1456 }
0x209c   :  { %v1459_v47 = vmul.f32 %v2144_v38, %v1457_v46 }
0x209e   :  { %v1461_v48 = vpack.c.bf16 %v1459_v47, %v1459_v47 }
0x20a0   :  { %1463 = vrot.lane.b32.xlu0 %v1461_v48, %s2178_s3  ;;  %v15_v48 = vstv %s2639_s8 }
0x20a1   :  { %16 = vst [vmem:[#allocation6] sm:$0x1] %v15_v48 }
0x2112   :  { %v1464_v50 = vpop.permute.xlu0 %1463 }
0x2113   :  { %1994 = vmatmul.mubr.msk.bf16.vlgmr.msra.gmra.mrb[32].mxu1 %vm44_vm0, %v1464_v50  ;;  %v17_v50 = vstv %s2640_s9 }
0x2114   :  { %2006 = vmatpush3.bf16.msra.mxu1 %v2462_v15  ;;  %2009 = vmatprep.mubr.msk.bf16.mxu1 %vm2176_vm1, %v2175_v0  ;;  %18 = vst [vmem:[#allocation7] sm:$0x1] %v17_v50 }
0x2115   :  { %2007 = vmatprep.subr.bf16.mxu1 %v2175_v0 }
0x2118   :  { %2008 = vmatpush3.bf16.msra.mxu1 %v2470_v17 }
0x21e6   :  { %v1502_v52 = vpop.f32.mrb[32].mxu1 }
0x21e7   :  { %v1508_v53 = vadd.f32 %v1502_v52, %v1055_v51  ;;  %v1995_v54 = vpop.f32.mrb[33].mxu1 }
0x21e8   :  { %v1505_v62 = vpop.f32.mrb[34].mxu1 }
0x21e9   :  { %2147 = vtanh.f32 %v1508_v53  ;;  %v1996_v55 = vpop.f32.mrb[35].mxu1  ;;  %v1795_v15 = vmul.f32 -1.442695, %v1508_v53  ;;  %v1800_v53 = vld [vmem:[%s2641_s7] ss:$0 sm:$0xff] }
0x21eb   :  { %2149 = vpow2.f32 %v1795_v15  ;;  %v1802_v15 = vld [vmem:[#allocation7] ss:$0 sm:$0xff] }
0x21f3   :  { %v2148_v21 = vpop.eup %2147 }
0x21f4   :  { %1518 = vrot.lane.b32.xlu1 %v2148_v21, %s2177_s24 }
0x21f5   :  { %v2150_v57 = vpop.eup %2149 }
0x21f6   :  { %v1512_v58 = vadd.f32 1.0, %v2150_v57 }
0x21f8   :  { %2151 = vrcp.f32 %v1512_v58 }
0x2202   :  { %v2152_v0 = vpop.eup %2151 }
0x2203   :  { %v1516_v12 = vmul.f32 %v2152_v0, %v1453_v44 }
0x2266   :  { %v1519_v59 = vpop.permute.xlu1 %1518 }
0x2267   :  { %v1521_v17 = vmul.f32 %v2152_v0, %v1519_v59 }
0x2269   :  { %1523 = vrot.lane.b32.xlu0 %v1521_v17, %s2178_s3 }
0x22db   :  { %v1524_v35 = vpop.permute.xlu0 %1523 }
0x22dc   :  { %v1526_v26 = vadd.f32 %v1524_v35, %v1516_v12 }
0x22de   :  { %2153 = vtanh.f32 %v1526_v26 }
0x22e8   :  { %v2154_v61 = vpop.eup %2153 }
0x22e9   :  { %1529 = vrot.lane.b32.xlu1 %v2154_v61, %s2177_s24 }
0x235b   :  { %v1530_v4 = vpop.permute.xlu1 %1529 }
0x235c   :  { %v1532_v56 = vmul.f32 %v2152_v0, %v1530_v4 }
0x235e   :  { %v1534_v60 = vpack.c.bf16 %v1532_v56, %v1532_v56 }
0x2360   :  { %1536 = vrot.lane.b32.xlu0 %v1534_v60, %s2178_s3 }
0x23d2   :  { %v1537_v6 = vpop.permute.xlu0 %1536 }
0x23d3   :  { %2002 = vmatmul.mubr.msk.bf16.vlgmr.msra.gmra.mrb[36].mxu0 %vm44_vm0, %v1537_v6 }
0x24a6   :  { %v1575_v49 = vpop.f32.mrb[36].mxu0 }
0x24a7   :  { %v1581_v7 = vadd.f32 %v1575_v49, %v1060_v63  ;;  %v2003_v10 = vpop.f32.mrb[37].mxu0 }
0x24a8   :  { %v1578_v11 = vpop.f32.mrb[38].mxu0 }
0x24a9   :  { %2155 = vtanh.f32 %v1581_v7  ;;  %v2004_v13 = vpop.f32.mrb[39].mxu0  ;;  %v1797_v5 = vmul.f32 -1.442695, %v1581_v7 }
0x24ab   :  { %2157 = vpow2.f32 %v1797_v5 }
0x24b3   :  { %v2156_v16 = vpop.eup %2155 }
0x24b4   :  { %1591 = vrot.lane.b32.xlu1 %v2156_v16, %s2177_s24 }
0x24b5   :  { %v2158_v14 = vpop.eup %2157 }
0x24b6   :  { %v1585_v18 = vadd.f32 1.0, %v2158_v14 }
0x24b8   :  { %2159 = vrcp.f32 %v1585_v18 }
0x24c2   :  { %v2160_v23 = vpop.eup %2159 }
0x24c3   :  { %v1589_v1 = vmul.f32 %v2160_v23, %v1526_v26 }
0x2526   :  { %v1592_v19 = vpop.permute.xlu1 %1591 }
0x2527   :  { %v1594_v9 = vmul.f32 %v2160_v23, %v1592_v19 }
0x2529   :  { %1596 = vrot.lane.b32.xlu0 %v1594_v9, %s2178_s3 }
0x259b   :  { %v1597_v20 = vpop.permute.xlu0 %1596 }
0x259c   :  { %v1599_v22 = vadd.f32 %v1597_v20, %v1589_v1 }
0x259e   :  { %2161 = vtanh.f32 %v1599_v22 }
0x25a8   :  { %v2162_v24 = vpop.eup %2161 }
0x25a9   :  { %1602 = vrot.lane.b32.xlu1 %v2162_v24, %s2177_s24 }
0x261b   :  { %v1603_v25 = vpop.permute.xlu1 %1602 }
0x261c   :  { %v1605_v27 = vmul.f32 %v2160_v23, %v1603_v25 }
0x261e   :  { %v1607_v28 = vpack.c.bf16 %v1605_v27, %v1605_v27 }
0x2620   :  { %1609 = vrot.lane.b32.xlu0 %v1607_v28, %s2178_s3 }
0x2692   :  { %v1610_v29 = vpop.permute.xlu0 %1609 }
0x2693   :  { %2010 = vmatmul.mubr.msk.bf16.vlgmr.msra.gmra.mrb[36].mxu1 %vm44_vm0, %v1610_v29 }
0x2766   :  { %v1648_v31 = vpop.f32.mrb[36].mxu1 }
0x2767   :  { %v1654_v32 = vadd.f32 %v1648_v31, %v1063_v30  ;;  %v2011_v33 = vpop.f32.mrb[37].mxu1 }
0x2768   :  { %v1651_v34 = vpop.f32.mrb[38].mxu1 }
0x2769   :  { %2163 = vtanh.f32 %v1654_v32  ;;  %v2012_v36 = vpop.f32.mrb[39].mxu1  ;;  %v1799_v39 = vmul.f32 -1.442695, %v1654_v32 }
0x276b   :  { %2165 = vpow2.f32 %v1799_v39 }
0x2773   :  { %v2164_v37 = vpop.eup %2163 }
0x2774   :  { %1664 = vrot.lane.b32.xlu1 %v2164_v37, %s2177_s24 }
0x2775   :  { %v2166_v38 = vpop.eup %2165 }
0x2776   :  { %v1658_v40 = vadd.f32 1.0, %v2166_v38 }
0x2778   :  { %2167 = vrcp.f32 %v1658_v40 }
0x2782   :  { %v2168_v8 = vpop.eup %2167 }
0x2783   :  { %v1662_v2 = vmul.f32 %v2168_v8, %v1599_v22 }
0x27e6   :  { %v1665_v41 = vpop.permute.xlu1 %1664 }
0x27e7   :  { %v1667_v43 = vmul.f32 %v2168_v8, %v1665_v41 }
0x27e9   :  { %1669 = vrot.lane.b32.xlu0 %v1667_v43, %s2178_s3 }
0x285b   :  { %v1670_v42 = vpop.permute.xlu0 %1669 }
0x285c   :  { %v1672_v44 = vadd.f32 %v1670_v42, %v1662_v2 }
0x285e   :  { %2169 = vtanh.f32 %v1672_v44 }
0x2868   :  { %v2170_v45 = vpop.eup %2169 }
0x2869   :  { %1675 = vrot.lane.b32.xlu1 %v2170_v45, %s2177_s24 }
0x28db   :  { %v1676_v46 = vpop.permute.xlu1 %1675 }
0x28dc   :  { %v1678_v47 = vmul.f32 %v2168_v8, %v1676_v46 }
0x28de   :  { %1680 = vrot.lane.b32.xlu0 %v1678_v47, %s2178_s3 }
0x28e2   :  { %950 = vrot.lane.b32.xlu0 %v2514_v3, %s2179_s25  ;;  %v1801_v3 = vld [vmem:[#allocation6] ss:$0 sm:$0xff] }
0x28e6   :  { %1685 = vrot.lane.b32.xlu0 %v1672_v44, %s2179_s25 }
0x2950   :  { %v1681_v51 = vpop.permute.xlu0 %1680 }
0x2951   :  { %1683 = vst.msk [vmem:[#allocation4 + $0x8] sm:$0xff] %vm44_vm0, %v1681_v51 }
0x2954   :  { %v951_v52 = vpop.permute.xlu0 %950 }
0x2955   :  { %953 = vst.msk [vmem:[#allocation5] sm:$0xff] %vm44_vm0, %v951_v52 }
0x2958   :  { %v1686_v54 = vpop.permute.xlu0 %1685  ;;  %v1692_v62 = vld [vmem:[#allocation4 + $0x8] sm:$0xff] }
0x2959   :  { %1688 = vst.msk [vmem:[#allocation5 + $0x8] sm:$0xff] %vm44_vm0, %v1686_v54  ;;  %v1700_v55 = vmul.f32 %v1800_v53, %v1692_v62 }
0x295b   :  { %v1701_v21 = vsel %vm44_vm0, %v1700_v55, 0.0 }
0x295c   :  { %1702 = vadd.xlane.f32.xlu1 %v1701_v21 }
0x29e9   :  { %v1703_v57 = vpop.xlane.xlu1 %1702 }
0x29ea   :  { %v1711_v58 = vadd.f32 %v1801_v3, %v1703_v57 }
0x29ec   :  { %v1719_v0 = vmul.f32 %v1802_v15, %v1711_v58 }
0x29ee   :  { %v1803_v59 = vmul.f32 -1.442695, %v1719_v0 }
0x29f0   :  { %2171 = vpow2.f32 %v1803_v59 }
0x29fa   :  { %v2172_v17 = vpop.eup %2171 }
0x29fb   :  { %v1723_v12 = vadd.f32 1.0, %v2172_v17 }
0x29fd   :  { %2173 = vrcp.f32 %v1723_v12 }
0x2a07   :  { %v2174_v35 = vpop.eup %2173 }
0x2a08   :  { %v1726_v26 = vmul.f32 %v2174_v35, %v1711_v58 }
0x2a0a   :  { %1728 = vst.msk [vmem:[%s2642_s10] sm:$0xff] %vm1727_vm3, %v1726_v26 }

</bundles_post_ra>
